<compile_context>
chip_gen: v7x
topology: tpu7x:2x2x1
jax: 0.10.0
libtpu: 0.0.40
codegen_flags: <defaults>
</compile_context>

<pallas_src>
import jax
import jax.numpy as jnp
from jax import lax
from jax.experimental import pallas as pl
from jax.experimental.pallas import tpu as pltpu


def _round_up(x, m):
    return (x + m - 1) // m * m


# ---------------------------------------------------------------------------
# Pallas kernels
# ---------------------------------------------------------------------------
def conv_relu_pool_kernel(xcol_ref, w_ref, b_ref, o_ref):
    """Fused conv (im2col matmul) + 2x2 max-pool + bias + ReLU for one M-tile.

    xcol_ref: (4, TM, K)  bf16 -- 4 pool-offset slabs of im2col patches
    w_ref:    (K, Cout)   bf16 -- VMEM-resident across the grid
    b_ref:    (1, Cout)   f32  -- VMEM-resident across the grid
    o_ref:    (TM, Cout)  f32  -- pooled output rows for this tile
    """
    tm = xcol_ref.shape[1]
    k = xcol_ref.shape[2]
    cout = w_ref.shape[1]

    # Fold the 4 pool slabs into a single MXU matmul (amortizes fill/drain).
    x = xcol_ref[...].reshape(4 * tm, k)
    y = jnp.dot(x, w_ref[...], preferred_element_type=jnp.float32)
    y = y.reshape(4, tm, cout)

    # max over the 4 pool offsets, then ONE bias add + ONE ReLU (commute w/ max)
    r = jnp.max(y, axis=0)
    r = jnp.maximum(r + b_ref[...], 0.0)
    o_ref[...] = r.astype(o_ref.dtype)


def mlp_kernel(x_ref, w1_ref, b1_ref, w2_ref, b2_ref, o_ref):
    """Fused fc1 + ReLU + fc2 for one batch tile (weights VMEM-resident)."""
    h = jnp.dot(x_ref[...], w1_ref[...],
                preferred_element_type=jnp.float32) + b1_ref[...]
    h = jnp.maximum(h, 0.0)
    o_ref[...] = jnp.dot(h.astype(w2_ref.dtype), w2_ref[...],
                         preferred_element_type=jnp.float32) + b2_ref[...]


# ---------------------------------------------------------------------------
# Pallas wrappers (grid over rows / batch, double-buffered by BlockSpec)
# ---------------------------------------------------------------------------
_COMPILER_PARAMS = pltpu.CompilerParams(
    dimension_semantics=("parallel",),
    vmem_limit_bytes=32 * 1024 * 1024,
)


def conv_relu_pool(xcol, w, b, tm=512):
    """xcol: (4, M, K) bf16, w: (K, Cout) bf16, b: (1, Cout) f32 -> (M, Cout) f32."""
    _, m, k = xcol.shape
    cout = w.shape[1]

    # TM: multiple of 16 (bf16 sublane packing), capped at 512, padded grid.
    tm = min(tm, _round_up(m, 16))
    mp = _round_up(m, tm)
    if mp != m:
        xcol = jnp.pad(xcol, ((0, 0), (0, mp - m), (0, 0)))

    out = pl.pallas_call(
        conv_relu_pool_kernel,
        out_shape=jax.ShapeDtypeStruct((mp, cout), jnp.float32),
        grid=(mp // tm,),
        in_specs=[
            pl.BlockSpec((4, tm, k), lambda i: (0, i, 0)),   # streamed row tiles
            pl.BlockSpec((k, cout), lambda i: (0, 0)),       # resident weights
            pl.BlockSpec((1, cout), lambda i: (0, 0)),       # resident bias
        ],
        out_specs=pl.BlockSpec((tm, cout), lambda i: (i, 0)),
        compiler_params=_COMPILER_PARAMS,
    )(xcol, w, b)
    return out[:m]


def mlp(x, w1, b1, w2, b2, tn=256):
    """x: (N, K) bf16; w1: (K, H) bf16; w2: (H, C) bf16; b1/b2 f32 -> (N, C) f32."""
    n, k = x.shape
    h = w1.shape[1]
    c = w2.shape[1]

    tn = min(tn, _round_up(n, 16))
    np_ = _round_up(n, tn)
    if np_ != n:
        x = jnp.pad(x, ((0, np_ - n), (0, 0)))

    out = pl.pallas_call(
        mlp_kernel,
        out_shape=jax.ShapeDtypeStruct((np_, c), jnp.float32),
        grid=(np_ // tn,),
        in_specs=[
            pl.BlockSpec((tn, k), lambda i: (i, 0)),   # streamed activations
            pl.BlockSpec((k, h), lambda i: (0, 0)),    # resident fc1 weights
            pl.BlockSpec((1, h), lambda i: (0, 0)),    # resident fc1 bias
            pl.BlockSpec((h, c), lambda i: (0, 0)),    # resident fc2 weights
            pl.BlockSpec((1, c), lambda i: (0, 0)),    # resident fc2 bias
        ],
        out_specs=pl.BlockSpec((tn, c), lambda i: (i, 0)),
        compiler_params=_COMPILER_PARAMS,
    )(x, w1, b1, w2, b2)
    return out[:n]


# ---------------------------------------------------------------------------
# Plain-JAX glue: im2col with the four 2x2-pool offsets pre-separated
# ---------------------------------------------------------------------------
def im2col_pool_slabs(x):
    """x: (N, H, W, Cin) -> (4, N*(H//2)*(W//2), 9*Cin), padding=1, k=3."""
    n, hh, ww, cin = x.shape
    xp = jnp.pad(x, ((0, 0), (1, 1), (1, 1), (0, 0)))
    cols = []
    for kh in range(3):
        for kw in range(3):
            cols.append(xp[:, kh:kh + hh, kw:kw + ww, :])
    patches = jnp.stack(cols, axis=-2).reshape(n, hh, ww, 9 * cin)
    ho, wo = hh // 2, ww // 2
    slabs = []
    for dh in range(2):
        for dw in range(2):
            slabs.append(
                patches[:, dh::2, dw::2, :].reshape(n * ho * wo, 9 * cin))
    return jnp.stack(slabs, axis=0)


# ---------------------------------------------------------------------------
# Full forward pass (matches CharCNN.forward)
# ---------------------------------------------------------------------------
def char_cnn_forward(x_nchw, p):
    n = x_nchw.shape[0]
    x = jnp.transpose(x_nchw, (0, 2, 3, 1))  # NCHW -> NHWC

    # conv1 + relu + pool: (N,28,28,1) -> (N,14,14,16)
    xcol1 = im2col_pool_slabs(x).astype(jnp.bfloat16)
    y1 = conv_relu_pool(xcol1,
                        p["wc1"].reshape(9 * 1, 16).astype(jnp.bfloat16),
                        p["bc1"].reshape(1, 16))
    y1 = y1.reshape(n, 14, 14, 16)

    # conv2 + relu + pool: (N,14,14,16) -> (N,7,7,32)
    xcol2 = im2col_pool_slabs(y1).astype(jnp.bfloat16)
    y2 = conv_relu_pool(xcol2,
                        p["wc2"].reshape(9 * 16, 32).astype(jnp.bfloat16),
                        p["bc2"].reshape(1, 32))
    y2 = y2.reshape(n, 7, 7, 32)

    # flatten in PyTorch order (N, C*H*W)
    flat = jnp.transpose(y2, (0, 3, 1, 2)).reshape(n, 32 * 7 * 7)
    flat = flat.astype(jnp.bfloat16)

    # fc1 + relu + fc2
    return mlp(flat,
               p["w1"].astype(jnp.bfloat16), p["b1"].reshape(1, 128),
               p["w2"].astype(jnp.bfloat16), p["b2"].reshape(1, 2))


# ---------------------------------------------------------------------------
# Pure-JAX f32 reference for verification
# ---------------------------------------------------------------------------
def char_cnn_reference(x_nchw, p):
    x = jnp.transpose(x_nchw, (0, 2, 3, 1))
    dn = ("NHWC", "HWIO", "NHWC")
    y = lax.conv_general_dilated(x, p["wc1"], (1, 1), "SAME",
                                 dimension_numbers=dn) + p["bc1"]
    y = jnp.maximum(y, 0.0)
    y = lax.reduce_window(y, -jnp.inf, lax.max, (1, 2, 2, 1), (1, 2, 2, 1), "VALID")
    y = lax.conv_general_dilated(y, p["wc2"], (1, 1), "SAME",
                                 dimension_numbers=dn) + p["bc2"]
    y = jnp.maximum(y, 0.0)
    y = lax.reduce_window(y, -jnp.inf, lax.max, (1, 2, 2, 1), (1, 2, 2, 1), "VALID")
    flat = jnp.transpose(y, (0, 3, 1, 2)).reshape(x.shape[0], -1)
    h = jnp.maximum(flat @ p["w1"] + p["b1"], 0.0)
    return h @ p["w2"] + p["b2"]


# ---------------------------------------------------------------------------
# Deterministic parameter init (synthetic, matches nn.Module shapes)
# ---------------------------------------------------------------------------
def init_params(key):
    ks = jax.random.split(key, 8)
    return {
        # conv weights in HWIO layout (kh, kw, cin, cout)
        "wc1": jax.random.normal(ks[0], (3, 3, 1, 16), jnp.float32) * 0.2,
        "bc1": jax.random.normal(ks[1], (16,), jnp.float32) * 0.1,
        "wc2": jax.random.normal(ks[2], (3, 3, 16, 32), jnp.float32) * 0.05,
        "bc2": jax.random.normal(ks[3], (32,), jnp.float32) * 0.1,
        # linear weights stored as (in, out)
        "w1": jax.random.normal(ks[4], (32 * 7 * 7, 128), jnp.float32) * 0.02,
        "b1": jax.random.normal(ks[5], (128,), jnp.float32) * 0.1,
        "w2": jax.random.normal(ks[6], (128, 2), jnp.float32) * 0.1,
        "b2": jax.random.normal(ks[7], (2,), jnp.float32) * 0.1,
    }


if __name__ == "__main__":
    key = jax.random.PRNGKey(0)
    kx, kp = jax.random.split(key)
    # fc1 = Linear(32*7*7, 128) implies 28x28 spatial input after two 2x2 pools
    x = jax.random.normal(kx, (2, 1, 28, 28), jnp.float32)  # NCHW like PyTorch
    params = init_params(kp)

    out = jax.block_until_ready(jax.jit(char_cnn_forward)(x, params))
    ref = jax.block_until_ready(char_cnn_reference(x, params))

    assert out.shape == (2, 2), f"unexpected output shape {out.shape}"
    assert jnp.allclose(out, ref, rtol=5e-2, atol=5e-2), (out, ref)
    print("KERNEL_OK")
</pallas_src>

<mosaic_0001>
module attributes {stable_mosaic.version = 11 : i64} {
  func.func @conv_relu_pool_kernel(%arg0: i32, %arg1: memref<4x400x9xbf16, #tpu.memory_space<vmem>>, %arg2: memref<9x16xbf16, #tpu.memory_space<vmem>>, %arg3: memref<1x16xf32, #tpu.memory_space<vmem>>, %arg4: memref<400x16xf32, #tpu.memory_space<vmem>>) attributes {dimension_semantics = [#tpu.dimension_semantics<parallel>], iteration_bounds = array<i64: 1>, scalar_prefetch = 0 : i64, scratch_operands = 0 : i64, tpu.core_type = #tpu.core_type<tc>, window_params = [{transform_indices = @transform_0, window_bounds = array<i64: 4, 400, 9>}, {pipeline_mode = #tpu.pipeline_mode<synchronous>, transform_indices = @transform_1, window_bounds = array<i64: 9, 16>}, {pipeline_mode = #tpu.pipeline_mode<synchronous>, transform_indices = @transform_2, window_bounds = array<i64: 1, 16>}, {transform_indices = @transform_3, window_bounds = array<i64: 400, 16>}]} {
    %c0 = arith.constant 0 : index
    %c0_0 = arith.constant 0 : index
    %c0_1 = arith.constant 0 : index
    %0 = vector.load %arg1[%c0, %c0_0, %c0_1] : memref<4x400x9xbf16, #tpu.memory_space<vmem>>, vector<4x400x9xbf16>
    %1 = vector.shape_cast %0 : vector<4x400x9xbf16> to vector<1600x9xbf16>
    %c0_2 = arith.constant 0 : index
    %c0_3 = arith.constant 0 : index
    %2 = vector.load %arg2[%c0_2, %c0_3] : memref<9x16xbf16, #tpu.memory_space<vmem>>, vector<9x16xbf16>
    %cst = arith.constant dense<0.000000e+00> : vector<1600x16xf32>
    %3 = tpu.matmul %1, %2, %cst {dimension_numbers = #tpu.dot_dimension_numbers<[1], [0], [0], [1], [0, 0, 1, 1], [], []>} : vector<1600x9xbf16>, vector<9x16xbf16>, vector<1600x16xf32> -> vector<1600x16xf32>
    %4 = vector.shape_cast %3 : vector<1600x16xf32> to vector<4x400x16xf32>
    %cst_4 = arith.constant dense<0xFF800000> : vector<400x16xf32>
    %5 = vector.multi_reduction <maximumf>, %4, %cst_4 [0] : vector<4x400x16xf32> to vector<400x16xf32>
    %c0_5 = arith.constant 0 : index
    %c0_6 = arith.constant 0 : index
    %6 = vector.load %arg3[%c0_5, %c0_6] : memref<1x16xf32, #tpu.memory_space<vmem>>, vector<1x16xf32>
    %7 = vector.broadcast %6 : vector<1x16xf32> to vector<400x16xf32>
    %8 = arith.addf %5, %7 : vector<400x16xf32>
    %cst_7 = arith.constant 0.000000e+00 : f32
    %9 = vector.broadcast %cst_7 : f32 to vector<400x16xf32>
    %10 = arith.maximumf %8, %9 : vector<400x16xf32>
    %c0_8 = arith.constant 0 : index
    %c0_9 = arith.constant 0 : index
    %11 = vector.load %arg4[%c0_8, %c0_9] : memref<400x16xf32, #tpu.memory_space<vmem>>, vector<400x16xf32>
    tpu.vector_store %arg4[%c0_8, %c0_9], %10 {strides = array<i32>} : memref<400x16xf32, #tpu.memory_space<vmem>>, vector<400x16xf32>,
    return
  }
  func.func @transform_0(%arg0: i32) -> (i32, i32, i32) {
    %c0_i32 = arith.constant 0 : i32
    %c0_i32_0 = arith.constant 0 : i32
    %c0_i32_1 = arith.constant 0 : i32
    return %c0_i32, %arg0, %c0_i32_0 : i32, i32, i32
  }
  func.func @transform_1(%arg0: i32) -> (i32, i32) {
    %c0_i32 = arith.constant 0 : i32
    %c0_i32_0 = arith.constant 0 : i32
    %c0_i32_1 = arith.constant 0 : i32
    return %c0_i32, %c0_i32_0 : i32, i32
  }
  func.func @transform_2(%arg0: i32) -> (i32, i32) {
    %c0_i32 = arith.constant 0 : i32
    %c0_i32_0 = arith.constant 0 : i32
    %c0_i32_1 = arith.constant 0 : i32
    return %c0_i32, %c0_i32_0 : i32, i32
  }
  func.func @transform_3(%arg0: i32) -> (i32, i32) {
    %c0_i32 = arith.constant 0 : i32
    %c0_i32_0 = arith.constant 0 : i32
    return %arg0, %c0_i32 : i32, i32
  }
}

module attributes {stable_mosaic.version = 11 : i64} {
  func.func @conv_relu_pool_kernel(%arg0: i32, %arg1: memref<4x112x144xbf16, #tpu.memory_space<vmem>>, %arg2: memref<144x32xbf16, #tpu.memory_space<vmem>>, %arg3: memref<1x32xf32, #tpu.memory_space<vmem>>, %arg4: memref<112x32xf32, #tpu.memory_space<vmem>>) attributes {dimension_semantics = [#tpu.dimension_semantics<parallel>], iteration_bounds = array<i64: 1>, scalar_prefetch = 0 : i64, scratch_operands = 0 : i64, tpu.core_type = #tpu.core_type<tc>, window_params = [{transform_indices = @transform_0, window_bounds = array<i64: 4, 112, 144>}, {pipeline_mode = #tpu.pipeline_mode<synchronous>, transform_indices = @transform_1, window_bounds = array<i64: 144, 32>}, {pipeline_mode = #tpu.pipeline_mode<synchronous>, transform_indices = @transform_2, window_bounds = array<i64: 1, 32>}, {transform_indices = @transform_3, window_bounds = array<i64: 112, 32>}]} {
    %c0 = arith.constant 0 : index
    %c0_0 = arith.constant 0 : index
    %c0_1 = arith.constant 0 : index
    %0 = vector.load %arg1[%c0, %c0_0, %c0_1] : memref<4x112x144xbf16, #tpu.memory_space<vmem>>, vector<4x112x144xbf16>
    %1 = vector.shape_cast %0 : vector<4x112x144xbf16> to vector<448x144xbf16>
    %c0_2 = arith.constant 0 : index
    %c0_3 = arith.constant 0 : index
    %2 = vector.load %arg2[%c0_2, %c0_3] : memref<144x32xbf16, #tpu.memory_space<vmem>>, vector<144x32xbf16>
    %cst = arith.constant dense<0.000000e+00> : vector<448x32xf32>
    %3 = tpu.matmul %1, %2, %cst {dimension_numbers = #tpu.dot_dimension_numbers<[1], [0], [0], [1], [0, 0, 1, 1], [], []>} : vector<448x144xbf16>, vector<144x32xbf16>, vector<448x32xf32> -> vector<448x32xf32>
    %4 = vector.shape_cast %3 : vector<448x32xf32> to vector<4x112x32xf32>
    %cst_4 = arith.constant dense<0xFF800000> : vector<112x32xf32>
    %5 = vector.multi_reduction <maximumf>, %4, %cst_4 [0] : vector<4x112x32xf32> to vector<112x32xf32>
    %c0_5 = arith.constant 0 : index
    %c0_6 = arith.constant 0 : index
    %6 = vector.load %arg3[%c0_5, %c0_6] : memref<1x32xf32, #tpu.memory_space<vmem>>, vector<1x32xf32>
    %7 = vector.broadcast %6 : vector<1x32xf32> to vector<112x32xf32>
    %8 = arith.addf %5, %7 : vector<112x32xf32>
    %cst_7 = arith.constant 0.000000e+00 : f32
    %9 = vector.broadcast %cst_7 : f32 to vector<112x32xf32>
    %10 = arith.maximumf %8, %9 : vector<112x32xf32>
    %c0_8 = arith.constant 0 : index
    %c0_9 = arith.constant 0 : index
    %11 = vector.load %arg4[%c0_8, %c0_9] : memref<112x32xf32, #tpu.memory_space<vmem>>, vector<112x32xf32>
    tpu.vector_store %arg4[%c0_8, %c0_9], %10 {strides = array<i32>} : memref<112x32xf32, #tpu.memory_space<vmem>>, vector<112x32xf32>,
    return
  }
  func.func @transform_0(%arg0: i32) -> (i32, i32, i32) {
    %c0_i32 = arith.constant 0 : i32
    %c0_i32_0 = arith.constant 0 : i32
    %c0_i32_1 = arith.constant 0 : i32
    return %c0_i32, %arg0, %c0_i32_0 : i32, i32, i32
  }
  func.func @transform_1(%arg0: i32) -> (i32, i32) {
    %c0_i32 = arith.constant 0 : i32
    %c0_i32_0 = arith.constant 0 : i32
    %c0_i32_1 = arith.constant 0 : i32
    return %c0_i32, %c0_i32_0 : i32, i32
  }
  func.func @transform_2(%arg0: i32) -> (i32, i32) {
    %c0_i32 = arith.constant 0 : i32
    %c0_i32_0 = arith.constant 0 : i32
    %c0_i32_1 = arith.constant 0 : i32
    return %c0_i32, %c0_i32_0 : i32, i32
  }
  func.func @transform_3(%arg0: i32) -> (i32, i32) {
    %c0_i32 = arith.constant 0 : i32
    %c0_i32_0 = arith.constant 0 : i32
    return %arg0, %c0_i32 : i32, i32
  }
}

module attributes {stable_mosaic.version = 11 : i64} {
  func.func @mlp_kernel(%arg0: i32, %arg1: memref<16x1568xbf16, #tpu.memory_space<vmem>>, %arg2: memref<1568x128xbf16, #tpu.memory_space<vmem>>, %arg3: memref<1x128xf32, #tpu.memory_space<vmem>>, %arg4: memref<128x2xbf16, #tpu.memory_space<vmem>>, %arg5: memref<1x2xf32, #tpu.memory_space<vmem>>, %arg6: memref<16x2xf32, #tpu.memory_space<vmem>>) attributes {dimension_semantics = [#tpu.dimension_semantics<parallel>], iteration_bounds = array<i64: 1>, scalar_prefetch = 0 : i64, scratch_operands = 0 : i64, tpu.core_type = #tpu.core_type<tc>, window_params = [{transform_indices = @transform_0, window_bounds = array<i64: 16, 1568>}, {pipeline_mode = #tpu.pipeline_mode<synchronous>, transform_indices = @transform_1, window_bounds = array<i64: 1568, 128>}, {pipeline_mode = #tpu.pipeline_mode<synchronous>, transform_indices = @transform_2, window_bounds = array<i64: 1, 128>}, {pipeline_mode = #tpu.pipeline_mode<synchronous>, transform_indices = @transform_3, window_bounds = array<i64: 128, 2>}, {pipeline_mode = #tpu.pipeline_mode<synchronous>, transform_indices = @transform_4, window_bounds = array<i64: 1, 2>}, {transform_indices = @transform_5, window_bounds = array<i64: 16, 2>}]} {
    %c0 = arith.constant 0 : index
    %c0_0 = arith.constant 0 : index
    %0 = vector.load %arg1[%c0, %c0_0] : memref<16x1568xbf16, #tpu.memory_space<vmem>>, vector<16x1568xbf16>
    %c0_1 = arith.constant 0 : index
    %c0_2 = arith.constant 0 : index
    %1 = vector.load %arg2[%c0_1, %c0_2] : memref<1568x128xbf16, #tpu.memory_space<vmem>>, vector<1568x128xbf16>
    %cst = arith.constant dense<0.000000e+00> : vector<16x128xf32>
    %2 = tpu.matmul %0, %1, %cst {dimension_numbers = #tpu.dot_dimension_numbers<[1], [0], [0], [1], [0, 0, 1, 1], [], []>} : vector<16x1568xbf16>, vector<1568x128xbf16>, vector<16x128xf32> -> vector<16x128xf32>
    %c0_3 = arith.constant 0 : index
    %c0_4 = arith.constant 0 : index
    %3 = vector.load %arg3[%c0_3, %c0_4] : memref<1x128xf32, #tpu.memory_space<vmem>>, vector<1x128xf32>
    %4 = vector.broadcast %3 : vector<1x128xf32> to vector<16x128xf32>
    %5 = arith.addf %2, %4 : vector<16x128xf32>
    %cst_5 = arith.constant 0.000000e+00 : f32
    %6 = vector.broadcast %cst_5 : f32 to vector<16x128xf32>
    %7 = arith.maximumf %5, %6 : vector<16x128xf32>
    %8 = arith.truncf %7 : vector<16x128xf32> to vector<16x128xbf16>
    %c0_6 = arith.constant 0 : index
    %c0_7 = arith.constant 0 : index
    %9 = vector.load %arg4[%c0_6, %c0_7] : memref<128x2xbf16, #tpu.memory_space<vmem>>, vector<128x2xbf16>
    %cst_8 = arith.constant dense<0.000000e+00> : vector<16x2xf32>
    %10 = tpu.matmul %8, %9, %cst_8 {dimension_numbers = #tpu.dot_dimension_numbers<[1], [0], [0], [1], [0, 0, 1, 1], [], []>} : vector<16x128xbf16>, vector<128x2xbf16>, vector<16x2xf32> -> vector<16x2xf32>
    %c0_9 = arith.constant 0 : index
    %c0_10 = arith.constant 0 : index
    %11 = vector.load %arg5[%c0_9, %c0_10] : memref<1x2xf32, #tpu.memory_space<vmem>>, vector<1x2xf32>
    %12 = vector.broadcast %11 : vector<1x2xf32> to vector<16x2xf32>
    %13 = arith.addf %10, %12 : vector<16x2xf32>
    %c0_11 = arith.constant 0 : index
    %c0_12 = arith.constant 0 : index
    %14 = vector.load %arg6[%c0_11, %c0_12] : memref<16x2xf32, #tpu.memory_space<vmem>>, vector<16x2xf32>
    tpu.vector_store %arg6[%c0_11, %c0_12], %13 {strides = array<i32>} : memref<16x2xf32, #tpu.memory_space<vmem>>, vector<16x2xf32>,
    return
  }
  func.func @transform_0(%arg0: i32) -> (i32, i32) {
    %c0_i32 = arith.constant 0 : i32
    %c0_i32_0 = arith.constant 0 : i32
    return %arg0, %c0_i32 : i32, i32
  }
  func.func @transform_1(%arg0: i32) -> (i32, i32) {
    %c0_i32 = arith.constant 0 : i32
    %c0_i32_0 = arith.constant 0 : i32
    %c0_i32_1 = arith.constant 0 : i32
    return %c0_i32, %c0_i32_0 : i32, i32
  }
  func.func @transform_2(%arg0: i32) -> (i32, i32) {
    %c0_i32 = arith.constant 0 : i32
    %c0_i32_0 = arith.constant 0 : i32
    %c0_i32_1 = arith.constant 0 : i32
    return %c0_i32, %c0_i32_0 : i32, i32
  }
  func.func @transform_3(%arg0: i32) -> (i32, i32) {
    %c0_i32 = arith.constant 0 : i32
    %c0_i32_0 = arith.constant 0 : i32
    %c0_i32_1 = arith.constant 0 : i32
    return %c0_i32, %c0_i32_0 : i32, i32
  }
  func.func @transform_4(%arg0: i32) -> (i32, i32) {
    %c0_i32 = arith.constant 0 : i32
    %c0_i32_0 = arith.constant 0 : i32
    %c0_i32_1 = arith.constant 0 : i32
    return %c0_i32, %c0_i32_0 : i32, i32
  }
  func.func @transform_5(%arg0: i32) -> (i32, i32) {
    %c0_i32 = arith.constant 0 : i32
    %c0_i32_0 = arith.constant 0 : i32
    return %arg0, %c0_i32 : i32, i32
  }
}

</mosaic_0001>

<bundles_post_ra>
// kernel: char_cnn_forward.3
= control target key start
LH: loop header
LB: loop body
LE: loop exit
PB: predicated region body
PF: predicated region fallthrough
CT: control target
= control target key end

     0   :  { %vm1023_vm0 = vcmask 1043456   ;;  %vm1024_vm1 = vcmask 1044480   ;;  %vm722_vm2 = vcmask 72704   ;;  %v2985_v1 = vmov 65535   ;;  %s4423_s1 = inlined_call_operand.vmem [shape: bf16[9,16], index: 1, kind: input, shape index: {}]   ;;  %s4424_s0 = inlined_call_operand.vmem [shape: bf16[4,400,9], index: 0, kind: input, shape index: {}]   ;;  %s4425_s2 = inlined_call_operand.vmem [shape: f32[1,16], index: 2, kind: input, shape index: {}]   ;;  %s4426_s3 = inlined_call_operand.vmem [shape: f32[400,16], index: 3, kind: output, shape index: {}]  }
   0x1   :  { %v2883_v0 = vld [vmem:[%s4423_s1] sm:$0x1f]   ;;  %v1025_v2 = vsel %vm1023_vm0, 4294967295, %v2985_v1  ;;  %v2886_v6 = vld [vmem:[%s4424_s0 + $0x190] sm:$0xff]   ;;  %v2885_v7 = vld [vmem:[%s4424_s0 + $0x8] sm:$0xff]   ;;  %vm1863_vm3 = vcmask 130048  }
   0x2   :  { %v2884_v3 = vld [vmem:[%s4424_s0] sm:$0xff]   ;;  %v1026_v4 = vsel %vm1024_vm1, %v1025_v2, 0  ;;  %v2887_v8 = vld [vmem:[%s4424_s0 + $0x198] sm:$0xff]   ;;  %v2888_v9 = vld [vmem:[%s4424_s0 + $0x10] sm:$0xff]   ;;  %2780 = vmatprep.mubr.msk.bf16.mxu1 %vm722_vm2, %v2886_v6 }
   0x3   :  { %v1028_v5 = vand.u32 %v2883_v0, %v1026_v4  ;;  %2680 = vmatprep.mubr.msk.bf16.mxu0 %vm722_vm2, %v2884_v3  ;;  %v2890_v10 = vld [vmem:[%s4424_s0 + $0x1a0] sm:$0xff]   ;;  %v2889_v11 = vld [vmem:[%s4424_s0 + $0x18] sm:$0xff]   ;;  %v2891_v12 = vld [vmem:[%s4424_s0 + $0x1a8] sm:$0xff]  }
   0x4   :  { %v2892_v13 = vld [vmem:[%s4424_s0 + $0x20] sm:$0xff]   ;;  %v2894_v14 = vld [vmem:[%s4424_s0 + $0x1b0] sm:$0xff]   ;;  %v2893_v15 = vld [vmem:[%s4424_s0 + $0x28] sm:$0xff]  }
   0x5   :  { %2678 = vmatprep.subr.bf16.mxu0 %v1028_v5  ;;  %2880 = vmatprep.subr.bf16.mxu1 %v1028_v5  ;;  %v2895_v16 = vld [vmem:[%s4424_s0 + $0x1b8] sm:$0xff]   ;;  %v2896_v17 = vld [vmem:[%s4424_s0 + $0x30] sm:$0xff]   ;;  %v2898_v18 = vld [vmem:[%s4424_s0 + $0x1c0] sm:$0xff]  }
   0x6   :  { %2679 = vmatpush3.bf16.msra.mxu0 %v1028_v5  ;;  %2881 = vmatpush3.bf16.msra.mxu1 %v1028_v5  ;;  %v2897_v19 = vld [vmem:[%s4424_s0 + $0x38] sm:$0xff]   ;;  %v2899_v20 = vld [vmem:[%s4424_s0 + $0x1c8] sm:$0xff]   ;;  %v2900_v21 = vld [vmem:[%s4424_s0 + $0x40] sm:$0xff]  }
   0x7   :  { %v2902_v22 = vld [vmem:[%s4424_s0 + $0x1d0] sm:$0xff]   ;;  %v2901_v23 = vld [vmem:[%s4424_s0 + $0x48] sm:$0xff]   ;;  %v2903_v24 = vld [vmem:[%s4424_s0 + $0x1d8] sm:$0xff]  }
   0x8   :  { %v2904_v25 = vld [vmem:[%s4424_s0 + $0x50] sm:$0xff]   ;;  %v2906_v26 = vld [vmem:[%s4424_s0 + $0x1e0] sm:$0xff]   ;;  %v2905_v27 = vld [vmem:[%s4424_s0 + $0x58] sm:$0xff]  }
   0x9   :  { %2681 = vmatmul.mubr.msk.bf16.vlgmr.msra.gmra.mrb[0].mxu0 %vm722_vm2, %v2885_v7  ;;  %2781 = vmatmul.mubr.msk.bf16.vlgmr.msra.gmra.mrb[0].mxu1 %vm722_vm2, %v2887_v8  ;;  %v2907_v28 = vld [vmem:[%s4424_s0 + $0x1e8] sm:$0xff]   ;;  %v2908_v29 = vld [vmem:[%s4424_s0 + $0x60] sm:$0xff]   ;;  %v2910_v30 = vld [vmem:[%s4424_s0 + $0x1f0] sm:$0xff]  }
   0xa   :  { %2684 = vmatprep.mubr.msk.bf16.mxu0 %vm722_vm2, %v2888_v9  ;;  %2784 = vmatprep.mubr.msk.bf16.mxu1 %vm722_vm2, %v2890_v10  ;;  %v2909_v31 = vld [vmem:[%s4424_s0 + $0x68] sm:$0xff]   ;;  %v2911_v32 = vld [vmem:[%s4424_s0 + $0x1f8] sm:$0xff]   ;;  %v2912_v33 = vld [vmem:[%s4424_s0 + $0x70] sm:$0xff]  }
   0xb   :  { %v2914_v34 = vld [vmem:[%s4424_s0 + $0x200] sm:$0xff]   ;;  %v2913_v35 = vld [vmem:[%s4424_s0 + $0x78] sm:$0xff]   ;;  %v2915_v36 = vld [vmem:[%s4424_s0 + $0x208] sm:$0xff]  }
   0xc   :  { %v2916_v37 = vld [vmem:[%s4424_s0 + $0x80] sm:$0xff]   ;;  %v2918_v38 = vld [vmem:[%s4424_s0 + $0x210] sm:$0xff]   ;;  %v2917_v39 = vld [vmem:[%s4424_s0 + $0x88] sm:$0xff]  }
   0xd   :  { %v2919_v40 = vld [vmem:[%s4424_s0 + $0x218] sm:$0xff]   ;;  %v2920_v41 = vld [vmem:[%s4424_s0 + $0x90] sm:$0xff]   ;;  %v2922_v42 = vld [vmem:[%s4424_s0 + $0x220] sm:$0xff]  }
   0xe   :  { %v2921_v43 = vld [vmem:[%s4424_s0 + $0x98] sm:$0xff]   ;;  %v2923_v44 = vld [vmem:[%s4424_s0 + $0x228] sm:$0xff]   ;;  %v2924_v45 = vld [vmem:[%s4424_s0 + $0xa0] sm:$0xff]  }
   0xf   :  { %v2926_v46 = vld [vmem:[%s4424_s0 + $0x230] sm:$0xff]   ;;  %v2925_v47 = vld [vmem:[%s4424_s0 + $0xa8] sm:$0xff]   ;;  %v2927_v48 = vld [vmem:[%s4424_s0 + $0x238] sm:$0xff]  }
  0x10   :  { %v2928_v49 = vld [vmem:[%s4424_s0 + $0xb0] sm:$0xff]   ;;  %v2930_v50 = vld [vmem:[%s4424_s0 + $0x240] sm:$0xff]   ;;  %v2929_v51 = vld [vmem:[%s4424_s0 + $0xb8] sm:$0xff]  }
  0x11   :  { %2685 = vmatmul.mubr.msk.bf16.gmra.mrb[4].mxu0 %vm722_vm2, %v2889_v11  ;;  %2785 = vmatmul.mubr.msk.bf16.gmra.mrb[4].mxu1 %vm722_vm2, %v2891_v12  ;;  %v2931_v52 = vld [vmem:[%s4424_s0 + $0x248] sm:$0xff]   ;;  %v2932_v53 = vld [vmem:[%s4424_s0 + $0xc0] sm:$0xff]   ;;  %v2934_v54 = vld [vmem:[%s4424_s0 + $0x250] sm:$0xff]  }
  0x12   :  { %2688 = vmatprep.mubr.msk.bf16.mxu0 %vm722_vm2, %v2892_v13  ;;  %2788 = vmatprep.mubr.msk.bf16.mxu1 %vm722_vm2, %v2894_v14  ;;  %v2933_v55 = vld [vmem:[%s4424_s0 + $0xc8] sm:$0xff]   ;;  %v2935_v56 = vld [vmem:[%s4424_s0 + $0x258] sm:$0xff]   ;;  %v2936_v57 = vld [vmem:[%s4424_s0 + $0xd0] sm:$0xff]  }
  0x13   :  { %v2938_v58 = vld [vmem:[%s4424_s0 + $0x260] sm:$0xff]   ;;  %v2937_v59 = vld [vmem:[%s4424_s0 + $0xd8] sm:$0xff]   ;;  %v2939_v60 = vld [vmem:[%s4424_s0 + $0x268] sm:$0xff]  }
  0x14   :  { %v2940_v61 = vld [vmem:[%s4424_s0 + $0xe0] sm:$0xff]   ;;  %v2942_v62 = vld [vmem:[%s4424_s0 + $0x270] sm:$0xff]   ;;  %v2941_v63 = vld [vmem:[%s4424_s0 + $0xe8] sm:$0xff]  }
  0x15   :  { %v2943_v0 = vld [vmem:[%s4424_s0 + $0x278] sm:$0xff]   ;;  %v2944_v1 = vld [vmem:[%s4424_s0 + $0xf0] sm:$0xff]   ;;  %v2946_v2 = vld [vmem:[%s4424_s0 + $0x280] sm:$0xff]  }
  0x16   :  { %v2945_v3 = vld [vmem:[%s4424_s0 + $0xf8] sm:$0xff]   ;;  %v2947_v4 = vld [vmem:[%s4424_s0 + $0x288] sm:$0xff]   ;;  %v2948_v5 = vld [vmem:[%s4424_s0 + $0x100] sm:$0xff]  }
  0x17   :  { %v2950_v6 = vld [vmem:[%s4424_s0 + $0x290] sm:$0xff]   ;;  %v2949_v7 = vld [vmem:[%s4424_s0 + $0x108] sm:$0xff]   ;;  %v2951_v8 = vld [vmem:[%s4424_s0 + $0x298] sm:$0xff]  }
  0x18   :  { %v2952_v9 = vld [vmem:[%s4424_s0 + $0x110] sm:$0xff]   ;;  %v2954_v10 = vld [vmem:[%s4424_s0 + $0x2a0] sm:$0xff]   ;;  %v2953_v11 = vld [vmem:[%s4424_s0 + $0x118] sm:$0xff]  }
  0x19   :  { %2689 = vmatmul.mubr.msk.bf16.gmra.mrb[8].mxu0 %vm722_vm2, %v2893_v15  ;;  %2789 = vmatmul.mubr.msk.bf16.gmra.mrb[8].mxu1 %vm722_vm2, %v2895_v16  ;;  %v2955_v12 = vld [vmem:[%s4424_s0 + $0x2a8] sm:$0xff]   ;;  %v2956_v13 = vld [vmem:[%s4424_s0 + $0x120] sm:$0xff]   ;;  %v2958_v14 = vld [vmem:[%s4424_s0 + $0x2b0] sm:$0xff]  }
  0x1a   :  { %2692 = vmatprep.mubr.msk.bf16.mxu0 %vm722_vm2, %v2896_v17  ;;  %2792 = vmatprep.mubr.msk.bf16.mxu1 %vm722_vm2, %v2898_v18  ;;  %v2957_v15 = vld [vmem:[%s4424_s0 + $0x128] sm:$0xff]   ;;  %v2959_v16 = vld [vmem:[%s4424_s0 + $0x2b8] sm:$0xff]   ;;  %v2960_v17 = vld [vmem:[%s4424_s0 + $0x130] sm:$0xff]  }
  0x1b   :  { %v2962_v18 = vld [vmem:[%s4424_s0 + $0x2c0] sm:$0xff]  }
  0x21   :  { %2693 = vmatmul.mubr.msk.bf16.gmra.mrb[12].mxu0 %vm722_vm2, %v2897_v19  ;;  %2793 = vmatmul.mubr.msk.bf16.gmra.mrb[12].mxu1 %vm722_vm2, %v2899_v20  ;;  %v2961_v19 = vld [vmem:[%s4424_s0 + $0x138] sm:$0xff]   ;;  %v2963_v20 = vld [vmem:[%s4424_s0 + $0x2c8] sm:$0xff]  }
  0x22   :  { %2696 = vmatprep.mubr.msk.bf16.mxu0 %vm722_vm2, %v2900_v21  ;;  %2796 = vmatprep.mubr.msk.bf16.mxu1 %vm722_vm2, %v2902_v22  ;;  %v2964_v21 = vld [vmem:[%s4424_s0 + $0x140] sm:$0xff]   ;;  %v2966_v22 = vld [vmem:[%s4424_s0 + $0x2d0] sm:$0xff]  }
  0x29   :  { %2697 = vmatmul.mubr.msk.bf16.gmra.mrb[16].mxu0 %vm722_vm2, %v2901_v23  ;;  %2797 = vmatmul.mubr.msk.bf16.gmra.mrb[16].mxu1 %vm722_vm2, %v2903_v24  ;;  %v2965_v23 = vld [vmem:[%s4424_s0 + $0x148] sm:$0xff]   ;;  %v2967_v24 = vld [vmem:[%s4424_s0 + $0x2d8] sm:$0xff]  }
  0x2a   :  { %2700 = vmatprep.mubr.msk.bf16.mxu0 %vm722_vm2, %v2904_v25  ;;  %2800 = vmatprep.mubr.msk.bf16.mxu1 %vm722_vm2, %v2906_v26  ;;  %v2968_v25 = vld [vmem:[%s4424_s0 + $0x150] sm:$0xff]   ;;  %v2970_v26 = vld [vmem:[%s4424_s0 + $0x2e0] sm:$0xff]  }
  0x31   :  { %2701 = vmatmul.mubr.msk.bf16.gmra.mrb[20].mxu0 %vm722_vm2, %v2905_v27  ;;  %2801 = vmatmul.mubr.msk.bf16.gmra.mrb[20].mxu1 %vm722_vm2, %v2907_v28  ;;  %v2969_v27 = vld [vmem:[%s4424_s0 + $0x158] sm:$0xff]   ;;  %v2971_v28 = vld [vmem:[%s4424_s0 + $0x2e8] sm:$0xff]  }
  0x32   :  { %2704 = vmatprep.mubr.msk.bf16.mxu0 %vm722_vm2, %v2908_v29  ;;  %2804 = vmatprep.mubr.msk.bf16.mxu1 %vm722_vm2, %v2910_v30  ;;  %v2972_v29 = vld [vmem:[%s4424_s0 + $0x160] sm:$0xff]   ;;  %v2974_v30 = vld [vmem:[%s4424_s0 + $0x2f0] sm:$0xff]  }
  0x39   :  { %2705 = vmatmul.mubr.msk.bf16.gmra.mrb[24].mxu0 %vm722_vm2, %v2909_v31  ;;  %2805 = vmatmul.mubr.msk.bf16.gmra.mrb[24].mxu1 %vm722_vm2, %v2911_v32  ;;  %v2973_v31 = vld [vmem:[%s4424_s0 + $0x168] sm:$0xff]   ;;  %v2975_v32 = vld [vmem:[%s4424_s0 + $0x2f8] sm:$0xff]  }
  0x3a   :  { %2708 = vmatprep.mubr.msk.bf16.mxu0 %vm722_vm2, %v2912_v33  ;;  %2808 = vmatprep.mubr.msk.bf16.mxu1 %vm722_vm2, %v2914_v34  ;;  %v2976_v33 = vld [vmem:[%s4424_s0 + $0x170] sm:$0xff]   ;;  %v2978_v34 = vld [vmem:[%s4424_s0 + $0x300] sm:$0xff]  }
  0x41   :  { %2709 = vmatmul.mubr.msk.bf16.gmra.mrb[28].mxu0 %vm722_vm2, %v2913_v35  ;;  %2809 = vmatmul.mubr.msk.bf16.gmra.mrb[28].mxu1 %vm722_vm2, %v2915_v36  ;;  %v2977_v35 = vld [vmem:[%s4424_s0 + $0x178] sm:$0xff]   ;;  %v2979_v36 = vld [vmem:[%s4424_s0 + $0x308] sm:$0xff]  }
  0x42   :  { %2712 = vmatprep.mubr.msk.bf16.mxu0 %vm722_vm2, %v2916_v37  ;;  %2812 = vmatprep.mubr.msk.bf16.mxu1 %vm722_vm2, %v2918_v38  ;;  %v2980_v37 = vld [vmem:[%s4424_s0 + $0x180] sm:$0xff]   ;;  %v2982_v38 = vld [vmem:[%s4424_s0 + $0x310] sm:$0xff]  }
  0x49   :  { %2713 = vmatmul.mubr.msk.bf16.gmra.mrb[32].mxu0 %vm722_vm2, %v2917_v39  ;;  %2813 = vmatmul.mubr.msk.bf16.gmra.mrb[32].mxu1 %vm722_vm2, %v2919_v40  ;;  %v2981_v39 = vld [vmem:[%s4424_s0 + $0x188] sm:$0xff]   ;;  %v2983_v40 = vld [vmem:[%s4424_s0 + $0x318] sm:$0xff]  }
  0x4a   :  { %2716 = vmatprep.mubr.msk.bf16.mxu0 %vm722_vm2, %v2920_v41  ;;  %2816 = vmatprep.mubr.msk.bf16.mxu1 %vm722_vm2, %v2922_v42 }
  0x51   :  { %2717 = vmatmul.mubr.msk.bf16.gmra.mrb[36].mxu0 %vm722_vm2, %v2921_v43  ;;  %2817 = vmatmul.mubr.msk.bf16.gmra.mrb[36].mxu1 %vm722_vm2, %v2923_v44 }
  0x52   :  { %2720 = vmatprep.mubr.msk.bf16.mxu0 %vm722_vm2, %v2924_v45  ;;  %2820 = vmatprep.mubr.msk.bf16.mxu1 %vm722_vm2, %v2926_v46 }
  0x59   :  { %2721 = vmatmul.mubr.msk.bf16.gmra.mrb[40].mxu0 %vm722_vm2, %v2925_v47  ;;  %2821 = vmatmul.mubr.msk.bf16.gmra.mrb[40].mxu1 %vm722_vm2, %v2927_v48 }
  0x5a   :  { %2724 = vmatprep.mubr.msk.bf16.mxu0 %vm722_vm2, %v2928_v49  ;;  %2824 = vmatprep.mubr.msk.bf16.mxu1 %vm722_vm2, %v2930_v50 }
  0x61   :  { %2725 = vmatmul.mubr.msk.bf16.gmra.mrb[44].mxu0 %vm722_vm2, %v2929_v51  ;;  %2825 = vmatmul.mubr.msk.bf16.gmra.mrb[44].mxu1 %vm722_vm2, %v2931_v52 }
  0x62   :  { %2728 = vmatprep.mubr.msk.bf16.mxu0 %vm722_vm2, %v2932_v53  ;;  %2828 = vmatprep.mubr.msk.bf16.mxu1 %vm722_vm2, %v2934_v54 }
  0x69   :  { %2729 = vmatmul.mubr.msk.bf16.gmra.mrb[48].mxu0 %vm722_vm2, %v2933_v55  ;;  %2829 = vmatmul.mubr.msk.bf16.gmra.mrb[48].mxu1 %vm722_vm2, %v2935_v56 }
  0x6a   :  { %2732 = vmatprep.mubr.msk.bf16.mxu0 %vm722_vm2, %v2936_v57  ;;  %2832 = vmatprep.mubr.msk.bf16.mxu1 %vm722_vm2, %v2938_v58 }
  0x71   :  { %2733 = vmatmul.mubr.msk.bf16.gmra.mrb[52].mxu0 %vm722_vm2, %v2937_v59  ;;  %2833 = vmatmul.mubr.msk.bf16.gmra.mrb[52].mxu1 %vm722_vm2, %v2939_v60 }
  0x72   :  { %2736 = vmatprep.mubr.msk.bf16.mxu0 %vm722_vm2, %v2940_v61  ;;  %2836 = vmatprep.mubr.msk.bf16.mxu1 %vm722_vm2, %v2942_v62 }
  0x79   :  { %2737 = vmatmul.mubr.msk.bf16.gmra.mrb[56].mxu0 %vm722_vm2, %v2941_v63  ;;  %2837 = vmatmul.mubr.msk.bf16.gmra.mrb[56].mxu1 %vm722_vm2, %v2943_v0 }
  0x7a   :  { %2740 = vmatprep.mubr.msk.bf16.mxu0 %vm722_vm2, %v2944_v1  ;;  %2840 = vmatprep.mubr.msk.bf16.mxu1 %vm722_vm2, %v2946_v2 }
  0x81   :  { %2741 = vmatmul.mubr.msk.bf16.gmra.mrb[60].mxu0 %vm722_vm2, %v2945_v3  ;;  %2841 = vmatmul.mubr.msk.bf16.gmra.mrb[60].mxu1 %vm722_vm2, %v2947_v4 }
  0x82   :  { %2744 = vmatprep.mubr.msk.bf16.mxu0 %vm722_vm2, %v2948_v5  ;;  %2844 = vmatprep.mubr.msk.bf16.mxu1 %vm722_vm2, %v2950_v6 }
  0x89   :  { %2745 = vmatmul.mubr.msk.bf16.gmra.mrb[64].mxu0 %vm722_vm2, %v2949_v7  ;;  %2845 = vmatmul.mubr.msk.bf16.gmra.mrb[64].mxu1 %vm722_vm2, %v2951_v8 }
  0x8a   :  { %2748 = vmatprep.mubr.msk.bf16.mxu0 %vm722_vm2, %v2952_v9  ;;  %2848 = vmatprep.mubr.msk.bf16.mxu1 %vm722_vm2, %v2954_v10 }
  0x91   :  { %2749 = vmatmul.mubr.msk.bf16.gmra.mrb[68].mxu0 %vm722_vm2, %v2953_v11  ;;  %2849 = vmatmul.mubr.msk.bf16.gmra.mrb[68].mxu1 %vm722_vm2, %v2955_v12 }
  0x92   :  { %2752 = vmatprep.mubr.msk.bf16.mxu0 %vm722_vm2, %v2956_v13  ;;  %2852 = vmatprep.mubr.msk.bf16.mxu1 %vm722_vm2, %v2958_v14 }
  0x99   :  { %2753 = vmatmul.mubr.msk.bf16.gmra.mrb[72].mxu0 %vm722_vm2, %v2957_v15  ;;  %2853 = vmatmul.mubr.msk.bf16.gmra.mrb[72].mxu1 %vm722_vm2, %v2959_v16 }
  0x9a   :  { %2756 = vmatprep.mubr.msk.bf16.mxu0 %vm722_vm2, %v2960_v17  ;;  %2856 = vmatprep.mubr.msk.bf16.mxu1 %vm722_vm2, %v2962_v18 }
  0xa1   :  { %2757 = vmatmul.mubr.msk.bf16.gmra.mrb[76].mxu0 %vm722_vm2, %v2961_v19  ;;  %2857 = vmatmul.mubr.msk.bf16.gmra.mrb[76].mxu1 %vm722_vm2, %v2963_v20 }
  0xa2   :  { %2760 = vmatprep.mubr.msk.bf16.mxu0 %vm722_vm2, %v2964_v21  ;;  %2860 = vmatprep.mubr.msk.bf16.mxu1 %vm722_vm2, %v2966_v22 }
  0xa9   :  { %2761 = vmatmul.mubr.msk.bf16.gmra.mrb[80].mxu0 %vm722_vm2, %v2965_v23  ;;  %2861 = vmatmul.mubr.msk.bf16.gmra.mrb[80].mxu1 %vm722_vm2, %v2967_v24 }
  0xaa   :  { %2764 = vmatprep.mubr.msk.bf16.mxu0 %vm722_vm2, %v2968_v25  ;;  %2864 = vmatprep.mubr.msk.bf16.mxu1 %vm722_vm2, %v2970_v26 }
  0xb1   :  { %2765 = vmatmul.mubr.msk.bf16.gmra.mrb[84].mxu0 %vm722_vm2, %v2969_v27  ;;  %2865 = vmatmul.mubr.msk.bf16.gmra.mrb[84].mxu1 %vm722_vm2, %v2971_v28 }
  0xb2   :  { %2768 = vmatprep.mubr.msk.bf16.mxu0 %vm722_vm2, %v2972_v29  ;;  %2868 = vmatprep.mubr.msk.bf16.mxu1 %vm722_vm2, %v2974_v30 }
  0xb9   :  { %2769 = vmatmul.mubr.msk.bf16.gmra.mrb[88].mxu0 %vm722_vm2, %v2973_v31  ;;  %2869 = vmatmul.mubr.msk.bf16.gmra.mrb[88].mxu1 %vm722_vm2, %v2975_v32 }
  0xba   :  { %2772 = vmatprep.mubr.msk.bf16.mxu0 %vm722_vm2, %v2976_v33  ;;  %2872 = vmatprep.mubr.msk.bf16.mxu1 %vm722_vm2, %v2978_v34 }
  0xc1   :  { %2773 = vmatmul.mubr.msk.bf16.gmra.mrb[92].mxu0 %vm722_vm2, %v2977_v35  ;;  %2873 = vmatmul.mubr.msk.bf16.gmra.mrb[92].mxu1 %vm722_vm2, %v2979_v36 }
  0xc2   :  { %2776 = vmatprep.mubr.msk.bf16.mxu0 %vm722_vm2, %v2980_v37  ;;  %2876 = vmatprep.mubr.msk.bf16.mxu1 %vm722_vm2, %v2982_v38 }
  0xc9   :  { %2777 = vmatmul.mubr.msk.bf16.gmra.mrb[96].mxu0 %vm722_vm2, %v2981_v39  ;;  %2877 = vmatmul.mubr.msk.bf16.gmra.mrb[96].mxu1 %vm722_vm2, %v2983_v40 }
  0xdc   :  { %v3409_v41 = vpop.f32.mrb[0].mxu0  ;;  %v3411_v42 = vpop.f32.mrb[0].mxu1 }
  0xdd   :  { %v3413_v43 = vpop.f32.mrb[1].mxu0  ;;  %v3415_v44 = vpop.f32.mrb[1].mxu1 }
  0xde   :  { %v3417_v45 = vpop.f32.mrb[2].mxu0  ;;  %v3419_v46 = vpop.f32.mrb[2].mxu1 }
  0xdf   :  { %v3421_v47 = vpop.f32.mrb[3].mxu0  ;;  %v3423_v48 = vpop.f32.mrb[3].mxu1 }
  0xe4   :  { %v3425_v49 = vpop.f32.mrb[4].mxu0  ;;  %v3427_v50 = vpop.f32.mrb[4].mxu1 }
  0xe5   :  { %v3429_v51 = vpop.f32.mrb[5].mxu0  ;;  %v3431_v52 = vpop.f32.mrb[5].mxu1 }
  0xe6   :  { %v3433_v53 = vpop.f32.mrb[6].mxu0  ;;  %v3435_v54 = vpop.f32.mrb[6].mxu1 }
  0xe7   :  { %v3437_v55 = vpop.f32.mrb[7].mxu0  ;;  %v3439_v56 = vpop.f32.mrb[7].mxu1 }
  0xec   :  { %v3441_v57 = vpop.f32.mrb[8].mxu0  ;;  %v3443_v58 = vpop.f32.mrb[8].mxu1 }
  0xed   :  { %v3445_v59 = vpop.f32.mrb[9].mxu0  ;;  %v3447_v60 = vpop.f32.mrb[9].mxu1 }
  0xee   :  { %v3449_v61 = vpop.f32.mrb[10].mxu0  ;;  %v3451_v62 = vpop.f32.mrb[10].mxu1 }
  0xef   :  { %v3453_v63 = vpop.f32.mrb[11].mxu0  ;;  %v3455_v0 = vpop.f32.mrb[11].mxu1 }
  0xf4   :  { %v3457_v1 = vpop.f32.mrb[12].mxu0  ;;  %v3459_v2 = vpop.f32.mrb[12].mxu1 }
  0xf5   :  { %v3461_v3 = vpop.f32.mrb[13].mxu0  ;;  %v3463_v4 = vpop.f32.mrb[13].mxu1 }
  0xf6   :  { %v3465_v5 = vpop.f32.mrb[14].mxu0  ;;  %v3467_v6 = vpop.f32.mrb[14].mxu1 }
  0xf7   :  { %v3469_v7 = vpop.f32.mrb[15].mxu0  ;;  %v3471_v8 = vpop.f32.mrb[15].mxu1 }
  0xfc   :  { %v3473_v9 = vpop.f32.mrb[16].mxu0  ;;  %v3475_v10 = vpop.f32.mrb[16].mxu1 }
  0xfd   :  { %v3477_v11 = vpop.f32.mrb[17].mxu0  ;;  %v3479_v12 = vpop.f32.mrb[17].mxu1 }
  0xfe   :  { %v3481_v13 = vpop.f32.mrb[18].mxu0  ;;  %v3483_v14 = vpop.f32.mrb[18].mxu1 }
  0xff   :  { %v3485_v15 = vpop.f32.mrb[19].mxu0  ;;  %v3487_v16 = vpop.f32.mrb[19].mxu1 }
 0x104   :  { %v3489_v17 = vpop.f32.mrb[20].mxu0  ;;  %v3491_v18 = vpop.f32.mrb[20].mxu1 }
 0x105   :  { %v3493_v19 = vpop.f32.mrb[21].mxu0  ;;  %v3495_v20 = vpop.f32.mrb[21].mxu1 }
 0x106   :  { %v3497_v21 = vpop.f32.mrb[22].mxu0  ;;  %v3499_v22 = vpop.f32.mrb[22].mxu1 }
 0x107   :  { %v3501_v23 = vpop.f32.mrb[23].mxu0  ;;  %v3503_v24 = vpop.f32.mrb[23].mxu1 }
 0x10c   :  { %v3505_v25 = vpop.f32.mrb[24].mxu0  ;;  %v3507_v26 = vpop.f32.mrb[24].mxu1 }
 0x10d   :  { %v3509_v27 = vpop.f32.mrb[25].mxu0  ;;  %v3511_v28 = vpop.f32.mrb[25].mxu1 }
 0x10e   :  { %v3513_v29 = vpop.f32.mrb[26].mxu0  ;;  %v3515_v30 = vpop.f32.mrb[26].mxu1 }
 0x10f   :  { %4427 = vst [vmem:[#allocation2_spill] sm:$0xff] %v3515_v30  ;;  %v3517_v31 = vpop.f32.mrb[27].mxu0  ;;  %v3519_v32 = vpop.f32.mrb[27].mxu1 }
 0x110   :  { %4428 = vst [vmem:[#allocation3_spill] sm:$0xff] %v3517_v31  ;;  %4429 = vst [vmem:[#allocation4_spill] sm:$0xff] %v3519_v32 }
 0x114   :  { %v3521_v33 = vpop.f32.mrb[28].mxu0  ;;  %v3523_v34 = vpop.f32.mrb[28].mxu1 }
 0x115   :  { %4430 = vst [vmem:[#allocation5_spill] sm:$0xff] %v3521_v33  ;;  %4431 = vst [vmem:[#allocation6_spill] sm:$0xff] %v3523_v34  ;;  %v3525_v35 = vpop.f32.mrb[29].mxu0  ;;  %v3527_v36 = vpop.f32.mrb[29].mxu1 }
 0x116   :  { %4432 = vst [vmem:[#allocation7_spill] sm:$0xff] %v3525_v35  ;;  %4433 = vst [vmem:[#allocation8_spill] sm:$0xff] %v3527_v36  ;;  %v3529_v37 = vpop.f32.mrb[30].mxu0  ;;  %v3531_v38 = vpop.f32.mrb[30].mxu1 }
 0x117   :  { %4434 = vst [vmem:[#allocation9_spill] sm:$0xff] %v3529_v37  ;;  %4435 = vst [vmem:[#allocation10_spill] sm:$0xff] %v3531_v38  ;;  %v3533_v39 = vpop.f32.mrb[31].mxu0  ;;  %v3535_v40 = vpop.f32.mrb[31].mxu1 }
 0x118   :  { %4436 = vst [vmem:[#allocation11_spill] sm:$0xff] %v3533_v39  ;;  %4437 = vst [vmem:[#allocation12_spill] sm:$0xff] %v3535_v40 }
 0x11c   :  { %v3537_v30 = vpop.f32.mrb[32].mxu0  ;;  %v3539_v31 = vpop.f32.mrb[32].mxu1 }
 0x11d   :  { %4438 = vst [vmem:[#allocation13_spill] sm:$0xff] %v3537_v30  ;;  %4439 = vst [vmem:[#allocation14_spill] sm:$0xff] %v3539_v31  ;;  %v3541_v32 = vpop.f32.mrb[33].mxu0  ;;  %v3543_v33 = vpop.f32.mrb[33].mxu1 }
 0x11e   :  { %4440 = vst [vmem:[#allocation15_spill] sm:$0xff] %v3541_v32  ;;  %4441 = vst [vmem:[#allocation16_spill] sm:$0xff] %v3543_v33  ;;  %v3545_v34 = vpop.f32.mrb[34].mxu0  ;;  %v3547_v35 = vpop.f32.mrb[34].mxu1 }
 0x11f   :  { %4442 = vst [vmem:[#allocation17_spill] sm:$0xff] %v3545_v34  ;;  %4443 = vst [vmem:[#allocation18_spill] sm:$0xff] %v3547_v35  ;;  %v3549_v36 = vpop.f32.mrb[35].mxu0  ;;  %v3551_v37 = vpop.f32.mrb[35].mxu1 }
 0x120   :  { %4444 = vst [vmem:[#allocation19_spill] sm:$0xff] %v3549_v36  ;;  %4445 = vst [vmem:[#allocation20_spill] sm:$0xff] %v3551_v37 }
 0x124   :  { %v3553_v38 = vpop.f32.mrb[36].mxu0  ;;  %v3555_v39 = vpop.f32.mrb[36].mxu1 }
 0x125   :  { %4446 = vst [vmem:[#allocation21_spill] sm:$0xff] %v3553_v38  ;;  %4447 = vst [vmem:[#allocation22_spill] sm:$0xff] %v3555_v39  ;;  %v3557_v40 = vpop.f32.mrb[37].mxu0  ;;  %v3559_v30 = vpop.f32.mrb[37].mxu1 }
 0x126   :  { %4448 = vst [vmem:[#allocation23_spill] sm:$0xff] %v3557_v40  ;;  %4449 = vst [vmem:[#allocation24_spill] sm:$0xff] %v3559_v30  ;;  %v3561_v31 = vpop.f32.mrb[38].mxu0  ;;  %v3563_v32 = vpop.f32.mrb[38].mxu1 }
 0x127   :  { %4450 = vst [vmem:[#allocation25_spill] sm:$0xff] %v3561_v31  ;;  %4451 = vst [vmem:[#allocation26_spill] sm:$0xff] %v3563_v32  ;;  %v3565_v33 = vpop.f32.mrb[39].mxu0  ;;  %v3567_v34 = vpop.f32.mrb[39].mxu1 }
 0x128   :  { %4452 = vst [vmem:[#allocation27_spill] sm:$0xff] %v3565_v33  ;;  %4453 = vst [vmem:[#allocation28_spill] sm:$0xff] %v3567_v34 }
 0x12c   :  { %v3569_v35 = vpop.f32.mrb[40].mxu0  ;;  %v3571_v36 = vpop.f32.mrb[40].mxu1 }
 0x12d   :  { %4454 = vst [vmem:[#allocation29_spill] sm:$0xff] %v3569_v35  ;;  %4455 = vst [vmem:[#allocation30_spill] sm:$0xff] %v3571_v36  ;;  %v3573_v37 = vpop.f32.mrb[41].mxu0  ;;  %v3575_v38 = vpop.f32.mrb[41].mxu1 }
 0x12e   :  { %4456 = vst [vmem:[#allocation31_spill] sm:$0xff] %v3573_v37  ;;  %4457 = vst [vmem:[#allocation32_spill] sm:$0xff] %v3575_v38  ;;  %v3577_v39 = vpop.f32.mrb[42].mxu0  ;;  %v3579_v40 = vpop.f32.mrb[42].mxu1  ;;  %v3595_v38 = vsel %vm1863_vm3, %v3409_v41, -inf  ;;  %v3615_v41 = vsel %vm1863_vm3, %v3419_v46, -inf }
 0x12f   :  { %4458 = vst [vmem:[#allocation33_spill] sm:$0xff] %v3577_v39  ;;  %4459 = vst [vmem:[#allocation34_spill] sm:$0xff] %v3579_v40  ;;  %v3581_v30 = vpop.f32.mrb[43].mxu0  ;;  %v3583_v31 = vpop.f32.mrb[43].mxu1  ;;  %v3599_v40 = vsel %vm1863_vm3, %v3411_v42, -inf  ;;  %v3635_v46 = vsel %vm1863_vm3, %v3429_v51, -inf }
 0x130   :  { %4460 = vst [vmem:[#allocation35_spill] sm:$0xff] %v3581_v30  ;;  %4461 = vst [vmem:[#allocation36_spill] sm:$0xff] %v3583_v31  ;;  %v3659_v51 = vsel %vm1863_vm3, %v3441_v57, -inf  ;;  %v3683_v57 = vsel %vm1863_vm3, %v3453_v63, -inf  ;;  %v3703_v63 = vsel %vm1863_vm3, %v3465_v5, -inf  ;;  %v3716_v39 = vsel %vm1863_vm3, %v3469_v7, -inf }
 0x131   :  { %v3724_v5 = vsel %vm1863_vm3, %v3471_v8, -inf  ;;  %v3742_v8 = vsel %vm1863_vm3, %v3477_v11, -inf  ;;  %v3762_v11 = vsel %vm1863_vm3, %v3487_v16, -inf  ;;  %v3783_v16 = vsel %vm1863_vm3, %v3497_v21, -inf }
 0x134   :  { %v3585_v33 = vpop.f32.mrb[44].mxu0  ;;  %v3587_v34 = vpop.f32.mrb[44].mxu1 }
 0x135   :  { %4462 = vst [vmem:[#allocation37_spill] sm:$0xff] %v3585_v33  ;;  %4463 = vst [vmem:[#allocation38_spill] sm:$0xff] %v3587_v34  ;;  %v3589_v35 = vpop.f32.mrb[45].mxu0  ;;  %v3591_v36 = vpop.f32.mrb[45].mxu1  ;;  %v1864_v33 = vsel %vm1863_vm3, %v3413_v43, -inf  ;;  %v1874_v43 = vsel %vm1863_vm3, %v3423_v48, -inf }
 0x136   :  { %4464 = vst [vmem:[#allocation39_spill] sm:$0xff] %v3589_v35  ;;  %4465 = vst [vmem:[#allocation40_spill] sm:$0xff] %v3591_v36  ;;  %v3601_v30 = vpop.f32.mrb[46].mxu0  ;;  %v3603_v31 = vpop.f32.mrb[46].mxu1  ;;  %v3609_v35 = vsel %vm1863_vm3, %v3417_v45, -inf  ;;  %v1867_v36 = vsel %vm1863_vm3, %v3415_v44, -inf }
 0x137   :  { %4466 = vst [vmem:[#allocation41_spill] sm:$0xff] %v3601_v30  ;;  %4467 = vst [vmem:[#allocation42_spill] sm:$0xff] %v3603_v31  ;;  %v3617_v42 = vpop.f32.mrb[47].mxu0  ;;  %v3619_v34 = vpop.f32.mrb[47].mxu1  ;;  %v1871_v31 = vsel %vm1863_vm3, %v3421_v47, -inf  ;;  %v3627_v45 = vsel %vm1863_vm3, %v3425_v49, -inf }
 0x138   :  { %4468 = vst [vmem:[#allocation43_spill] sm:$0xff] %v3617_v42  ;;  %4469 = vst [vmem:[#allocation44_spill] sm:$0xff] %v3619_v34  ;;  %v3631_v44 = vsel %vm1863_vm3, %v3427_v50, -inf  ;;  %v3639_v34 = vsel %vm1863_vm3, %v3433_v53, -inf  ;;  %v3643_v47 = vsel %vm1863_vm3, %v3431_v52, -inf  ;;  %v3647_v48 = vsel %vm1863_vm3, %v3435_v54, -inf }
 0x139   :  { %v3651_v49 = vsel %vm1863_vm3, %v3437_v55, -inf  ;;  %v3655_v50 = vsel %vm1863_vm3, %v3439_v56, -inf  ;;  %v3663_v52 = vsel %vm1863_vm3, %v3443_v58, -inf  ;;  %v3667_v53 = vsel %vm1863_vm3, %v3445_v59, -inf }
 0x13a   :  { %v3671_v54 = vsel %vm1863_vm3, %v3449_v61, -inf  ;;  %v3675_v55 = vsel %vm1863_vm3, %v3447_v60, -inf  ;;  %v3679_v56 = vsel %vm1863_vm3, %v3451_v62, -inf  ;;  %v3687_v58 = vsel %vm1863_vm3, %v3455_v0, -inf }
 0x13b   :  { %v3691_v59 = vsel %vm1863_vm3, %v3457_v1, -inf  ;;  %v3695_v60 = vsel %vm1863_vm3, %v3459_v2, -inf  ;;  %v3699_v62 = vsel %vm1863_vm3, %v3461_v3, -inf  ;;  %v3707_v0 = vsel %vm1863_vm3, %v3463_v4, -inf }
 0x13c   :  { %v2730_v61 = vpop.f32.mrb[48].mxu0  ;;  %v2830_v42 = vpop.f32.mrb[48].mxu1  ;;  %v3720_v3 = vsel %vm1863_vm3, %v3467_v6, -inf }
 0x13d   :  { %v1865_v1 = vsel %vm1863_vm3, %v2730_v61, -inf  ;;  %v3710_v30 = vpop.f32.mrb[49].mxu0  ;;  %v3712_v2 = vpop.f32.mrb[49].mxu1  ;;  %4472 = vst [vmem:[#allocation47_spill] sm:$0xff] %v3720_v3  ;;  %v3728_v61 = vsel %vm1863_vm3, %v3473_v9, -inf  ;;  %v1869_v7 = vsel %vm1863_vm3, %v2830_v42, -inf }
 0x13e   :  { %4470 = vst [vmem:[#allocation45_spill] sm:$0xff] %v3710_v30  ;;  %4471 = vst [vmem:[#allocation46_spill] sm:$0xff] %v3712_v2  ;;  %v1866_v4 = vmax.f32 %v1864_v33, %v1865_v1  ;;  %v2731_v37 = vpop.f32.mrb[50].mxu0  ;;  %v2831_v32 = vpop.f32.mrb[50].mxu1  ;;  %v3732_v2 = vsel %vm1863_vm3, %v3475_v10, -inf  ;;  %v3746_v9 = vsel %vm1863_vm3, %v3479_v12, -inf }
 0x13f   :  { %v1872_v6 = vsel %vm1863_vm3, %v2731_v37, -inf  ;;  %v3736_v30 = vpop.f32.mrb[51].mxu0  ;;  %v3738_v3 = vpop.f32.mrb[51].mxu1  ;;  %v3750_v10 = vsel %vm1863_vm3, %v3481_v13, -inf  ;;  %v3754_v37 = vsel %vm1863_vm3, %v3485_v15, -inf  ;;  %v3758_v42 = vsel %vm1863_vm3, %v3483_v14, -inf }
 0x140   :  { %4473 = vst [vmem:[#allocation48_spill] sm:$0xff] %v3736_v30  ;;  %4474 = vst [vmem:[#allocation49_spill] sm:$0xff] %v3738_v3  ;;  %v1868_v33 = vmax.f32 %v1866_v4, %v1867_v36  ;;  %v1873_v1 = vmax.f32 %v1871_v31, %v1872_v6  ;;  %v3767_v12 = vld [vmem:[%s4425_s2] ss:$0 sm:$0xff]  ;;  %v3771_v13 = vsel %vm1863_vm3, %v3489_v17, -inf  ;;  %v3775_v15 = vsel %vm1863_vm3, %v3491_v18, -inf }
 0x141   :  { %v3779_v36 = vsel %vm1863_vm3, %v3493_v19, -inf  ;;  %v3787_v4 = vsel %vm1863_vm3, %v3495_v20, -inf  ;;  %v1876_v17 = vsel %vm1863_vm3, %v2831_v32, -inf  ;;  %v3792_v18 = vsel %vm1863_vm3, %v3501_v23, -inf }
 0x142   :  { %v1870_v31 = vmax.f32 %v1868_v33, %v1869_v7  ;;  %v1875_v14 = vmax.f32 %v1873_v1, %v1874_v43  ;;  %v3796_v43 = vsel %vm1863_vm3, %v3499_v22, -inf  ;;  %v3801_v33 = vsel %vm1863_vm3, %v3503_v24, -inf }
 0x143   :  { %4475 = vst [vmem:[#allocation50_spill] sm:$0xff] %v3796_v43  ;;  %v3805_v20 = vsel %vm1863_vm3, %v3505_v25, -inf  ;;  %v3809_v23 = vsel %vm1863_vm3, %v3507_v26, -inf }
 0x144   :  { %v2221_v19 = vadd.f32 %v3767_v12, %v1870_v31  ;;  %v1877_v7 = vmax.f32 %v1875_v14, %v1876_v17  ;;  %v2734_v6 = vpop.f32.mrb[52].mxu0  ;;  %v2834_v21 = vpop.f32.mrb[52].mxu1  ;;  %4476 = vst [vmem:[#allocation51_spill] sm:$0xff] %v3805_v20  ;;  %4477 = vst [vmem:[#allocation52_spill] sm:$0xff] %v3809_v23 }
 0x145   :  { %v1893_v22 = vsel %vm1863_vm3, %v2734_v6, -inf  ;;  %v1272_v32 = vpop.f32.mrb[53].mxu0  ;;  %v1672_v1 = vpop.f32.mrb[53].mxu1  ;;  %v1897_v20 = vsel %vm1863_vm3, %v2834_v21, -inf  ;;  %v3828_v21 = vsel %vm1863_vm3, %v3509_v27, -inf }
 0x146   :  { %v2271_v31 = vmax.f32 %v2221_v19, 0.0  ;;  %v2222_v14 = vadd.f32 %v3767_v12, %v1877_v7  ;;  %v1894_v17 = vmax.f32 %v3635_v46, %v1893_v22  ;;  %v1879_v24 = vsel %vm1863_vm3, %v1272_v32, -inf  ;;  %v2735_v3 = vpop.f32.mrb[54].mxu0  ;;  %v2835_v30 = vpop.f32.mrb[54].mxu1 }
 0x147   :  { %v1880_v25 = vmax.f32 %v3595_v38, %v1879_v24  ;;  %v1900_v26 = vsel %vm1863_vm3, %v2735_v3, -inf  ;;  %v1883_v23 = vsel %vm1863_vm3, %v1672_v1, -inf  ;;  %v1275_v6 = vpop.f32.mrb[55].mxu0  ;;  %v1675_v43 = vpop.f32.mrb[55].mxu1  ;;  %v3832_v3 = vsel %vm1863_vm3, %v3511_v28, -inf }
 0x148   :  { %2321 = vst.msk [vmem:[%s4426_s3] sm:$0xff] %vm1863_vm3, %v2271_v31  ;;  %v2272_v46 = vmax.f32 %v2222_v14, 0.0  ;;  %v1896_v19 = vmax.f32 %v1894_v17, %v3643_v47  ;;  %v1901_v7 = vmax.f32 %v3651_v49, %v1900_v26  ;;  %v1886_v38 = vsel %vm1863_vm3, %v1275_v6, -inf  ;;  %v4478_v47 = vld [vmem:[#allocation2_spill] sm:$0xff]  ;;  %v4479_v31 = vld [vmem:[#allocation3_spill] sm:$0xff]  ;;  %v4480_v17 = vld [vmem:[#allocation4_spill] sm:$0xff] }
 0x149   :  { %v1882_v22 = vmax.f32 %v1880_v25, %v3599_v40  ;;  %v1887_v32 = vmax.f32 %v3609_v35, %v1886_v38  ;;  %v3838_v1 = vsel %vm1863_vm3, %v3513_v29, -inf  ;;  %v3842_v49 = vsel %vm1863_vm3, %v4478_v47, -inf }
 0x14a   :  { %2322 = vst.msk [vmem:[%s4426_s3 + $0x8] sm:$0xff] %vm1863_vm3, %v2272_v46  ;;  %v1898_v27 = vmax.f32 %v1896_v19, %v1897_v20  ;;  %v1903_v28 = vmax.f32 %v1901_v7, %v3655_v50  ;;  %v3851_v40 = vsel %vm1863_vm3, %v4479_v31, -inf  ;;  %v1904_v29 = vsel %vm1863_vm3, %v2835_v30, -inf }
 0x14b   :  { %v1884_v35 = vmax.f32 %v1882_v22, %v1883_v23  ;;  %v1889_v14 = vmax.f32 %v1887_v32, %v3615_v41  ;;  %v3857_v24 = vsel %vm1863_vm3, %v4480_v17, -inf  ;;  %v1890_v20 = vsel %vm1863_vm3, %v1675_v43, -inf }
 0x14c   :  { %v2225_v25 = vadd.f32 %v3767_v12, %v1898_v27  ;;  %v1905_v26 = vmax.f32 %v1903_v28, %v1904_v29  ;;  %v2738_v6 = vpop.f32.mrb[56].mxu0  ;;  %v2838_v50 = vpop.f32.mrb[56].mxu1 }
 0x14d   :  { %v2223_v46 = vadd.f32 %v3767_v12, %v1884_v35  ;;  %v1891_v19 = vmax.f32 %v1889_v14, %v1890_v20  ;;  %v1921_v23 = vsel %vm1863_vm3, %v2738_v6, -inf  ;;  %v1288_v7 = vpop.f32.mrb[57].mxu0  ;;  %v1925_v30 = vsel %vm1863_vm3, %v2838_v50, -inf  ;;  %v1688_v41 = vpop.f32.mrb[57].mxu1  ;;  %v4481_v6 = vld [vmem:[#allocation5_spill] sm:$0xff] }
 0x14e   :  { %v2275_v38 = vmax.f32 %v2225_v25, 0.0  ;;  %v2226_v22 = vadd.f32 %v3767_v12, %v1905_v26  ;;  %v1922_v32 = vmax.f32 %v3667_v53, %v1921_v23  ;;  %v1907_v47 = vsel %vm1863_vm3, %v1288_v7, -inf  ;;  %v2739_v27 = vpop.f32.mrb[58].mxu0  ;;  %v2839_v43 = vpop.f32.mrb[58].mxu1  ;;  %v4482_v23 = vld [vmem:[#allocation6_spill] sm:$0xff] }
 0x14f   :  { %v2273_v28 = vmax.f32 %v2223_v46, 0.0  ;;  %v2224_v31 = vadd.f32 %v3767_v12, %v1891_v19  ;;  %v1908_v35 = vmax.f32 %v3627_v45, %v1907_v47  ;;  %v1928_v29 = vsel %vm1863_vm3, %v2739_v27, -inf  ;;  %v1291_v14 = vpop.f32.mrb[59].mxu0  ;;  %v1691_v17 = vpop.f32.mrb[59].mxu1  ;;  %v4485_v27 = vld [vmem:[#allocation9_spill] sm:$0xff] }
 0x150   :  { %2325 = vst.msk [vmem:[%s4426_s3 + $0x20] sm:$0xff] %vm1863_vm3, %v2275_v38  ;;  %v2276_v25 = vmax.f32 %v2226_v22, 0.0  ;;  %v1924_v53 = vmax.f32 %v1922_v32, %v3675_v55  ;;  %v1929_v26 = vmax.f32 %v3683_v57, %v1928_v29  ;;  %v1911_v20 = vsel %vm1863_vm3, %v1688_v41, -inf  ;;  %v4483_v38 = vld [vmem:[#allocation7_spill] sm:$0xff] }
 0x151   :  { %v3879_v50 = vsel %vm1863_vm3, %v4481_v6, -inf  ;;  %2323 = vst.msk [vmem:[%s4426_s3 + $0x10] sm:$0xff] %vm1863_vm3, %v2273_v28  ;;  %v2274_v45 = vmax.f32 %v2224_v31, 0.0  ;;  %v1910_v46 = vmax.f32 %v1908_v35, %v3631_v44  ;;  %v1914_v19 = vsel %vm1863_vm3, %v1291_v14, -inf  ;;  %v4484_v44 = vld [vmem:[#allocation8_spill] sm:$0xff]  ;;  %v4486_v14 = vld [vmem:[#allocation10_spill] sm:$0xff] }
 0x152   :  { %v3889_v55 = vsel %vm1863_vm3, %v4482_v23, -inf  ;;  %2326 = vst.msk [vmem:[%s4426_s3 + $0x28] sm:$0xff] %vm1863_vm3, %v2276_v25  ;;  %v1926_v57 = vmax.f32 %v1924_v53, %v1925_v30  ;;  %v1915_v7 = vmax.f32 %v3639_v34, %v1914_v19  ;;  %v1931_v41 = vmax.f32 %v1929_v26, %v3687_v58 }
 0x153   :  { %v3899_v22 = vsel %vm1863_vm3, %v4483_v38, -inf  ;;  %v3903_v32 = vsel %vm1863_vm3, %v4484_v44, -inf  ;;  %2324 = vst.msk [vmem:[%s4426_s3 + $0x18] sm:$0xff] %vm1863_vm3, %v2274_v45  ;;  %v1912_v47 = vmax.f32 %v1910_v46, %v1911_v20  ;;  %v1932_v30 = vsel %vm1863_vm3, %v2839_v43, -inf }
 0x154   :  { %v3912_v34 = vsel %vm1863_vm3, %v4485_v27, -inf  ;;  %v2229_v58 = vadd.f32 %v3767_v12, %v1926_v57  ;;  %v1933_v28 = vmax.f32 %v1931_v41, %v1932_v30  ;;  %v1917_v31 = vmax.f32 %v1915_v7, %v3647_v48  ;;  %v2742_v35 = vpop.f32.mrb[60].mxu0  ;;  %v2842_v29 = vpop.f32.mrb[60].mxu1 }
 0x155   :  { %v3918_v25 = vsel %vm1863_vm3, %v4486_v14, -inf  ;;  %v2227_v53 = vadd.f32 %v3767_v12, %v1912_v47  ;;  %v1918_v26 = vsel %vm1863_vm3, %v1691_v17, -inf  ;;  %v1949_v43 = vsel %vm1863_vm3, %v2742_v35, -inf  ;;  %v1304_v20 = vpop.f32.mrb[61].mxu0  ;;  %v1704_v6 = vpop.f32.mrb[61].mxu1 }
 0x156   :  { %v2279_v45 = vmax.f32 %v2229_v58, 0.0  ;;  %v2230_v46 = vadd.f32 %v3767_v12, %v1933_v28  ;;  %v1919_v19 = vmax.f32 %v1917_v31, %v1918_v26  ;;  %v1950_v48 = vmax.f32 %v3699_v62, %v1949_v43  ;;  %v2743_v23 = vpop.f32.mrb[62].mxu0  ;;  %v2843_v57 = vpop.f32.mrb[62].mxu1  ;;  %v4487_v28 = vld [vmem:[#allocation11_spill] sm:$0xff]  ;;  %v4488_v43 = vld [vmem:[#allocation12_spill] sm:$0xff] }
 0x157   :  { %v2277_v7 = vmax.f32 %v2227_v53, 0.0  ;;  %v1935_v41 = vsel %vm1863_vm3, %v1304_v20, -inf  ;;  %v1953_v38 = vsel %vm1863_vm3, %v2842_v29, -inf  ;;  %v1956_v44 = vsel %vm1863_vm3, %v2743_v23, -inf  ;;  %v1307_v17 = vpop.f32.mrb[63].mxu0  ;;  %v1707_v47 = vpop.f32.mrb[63].mxu1 }
 0x158   :  { %2329 = vst.msk [vmem:[%s4426_s3 + $0x40] sm:$0xff] %vm1863_vm3, %v2279_v45  ;;  %v2280_v30 = vmax.f32 %v2230_v46, 0.0  ;;  %v2228_v27 = vadd.f32 %v3767_v12, %v1919_v19  ;;  %v1936_v62 = vmax.f32 %v3659_v51, %v1935_v41  ;;  %v1952_v58 = vmax.f32 %v1950_v48, %v3707_v0  ;;  %v4490_v45 = vld [vmem:[#allocation14_spill] sm:$0xff] }
 0x159   :  { %v3937_v31 = vsel %vm1863_vm3, %v4487_v28, -inf  ;;  %2327 = vst.msk [vmem:[%s4426_s3 + $0x30] sm:$0xff] %vm1863_vm3, %v2277_v7  ;;  %v1957_v35 = vmax.f32 %v3716_v39, %v1956_v44  ;;  %v1939_v29 = vsel %vm1863_vm3, %v1704_v6, -inf  ;;  %v1942_v14 = vsel %vm1863_vm3, %v1307_v17, -inf  ;;  %v4489_v39 = vld [vmem:[#allocation13_spill] sm:$0xff] }
 0x15a   :  { %2330 = vst.msk [vmem:[%s4426_s3 + $0x48] sm:$0xff] %vm1863_vm3, %v2280_v30  ;;  %v2278_v51 = vmax.f32 %v2228_v27, 0.0  ;;  %v1954_v0 = vmax.f32 %v1952_v58, %v1953_v38  ;;  %v1938_v53 = vmax.f32 %v1936_v62, %v3663_v52  ;;  %v1943_v26 = vmax.f32 %v3671_v54, %v1942_v14  ;;  %v4491_v38 = vld [vmem:[#allocation15_spill] sm:$0xff] }
 0x15b   :  { %v3954_v20 = vsel %vm1863_vm3, %v4488_v43, -inf  ;;  %v3958_v6 = vsel %vm1863_vm3, %v4489_v39, -inf  ;;  %v3962_v46 = vsel %vm1863_vm3, %v4490_v45, -inf  ;;  %v1959_v19 = vmax.f32 %v1957_v35, %v3724_v5 }
 0x15c   :  { %2328 = vst.msk [vmem:[%s4426_s3 + $0x38] sm:$0xff] %vm1863_vm3, %v2278_v51  ;;  %v2233_v52 = vadd.f32 %v3767_v12, %v1954_v0  ;;  %v1940_v54 = vmax.f32 %v1938_v53, %v1939_v29  ;;  %v1960_v48 = vsel %vm1863_vm3, %v2843_v57, -inf  ;;  %v1945_v23 = vmax.f32 %v1943_v26, %v3679_v56  ;;  %v2746_v7 = vpop.f32.mrb[64].mxu0  ;;  %v2846_v41 = vpop.f32.mrb[64].mxu1 }
 0x15d   :  { %v3974_v44 = vsel %vm1863_vm3, %v4491_v38, -inf  ;;  %v1961_v17 = vmax.f32 %v1959_v19, %v1960_v48  ;;  %v1946_v5 = vsel %vm1863_vm3, %v1707_v47, -inf  ;;  %v1977_v30 = vsel %vm1863_vm3, %v2746_v7, -inf  ;;  %v1320_v27 = vpop.f32.mrb[65].mxu0  ;;  %v1720_v62 = vpop.f32.mrb[65].mxu1  ;;  %v4492_v38 = vld [vmem:[#allocation17_spill] sm:$0xff] }
 0x15e   :  { %v2283_v58 = vmax.f32 %v2233_v52, 0.0  ;;  %v2231_v28 = vadd.f32 %v3767_v12, %v1940_v54  ;;  %v1947_v35 = vmax.f32 %v1945_v23, %v1946_v5  ;;  %v1978_v57 = vmax.f32 %v3742_v8, %v1977_v30  ;;  %v2747_v56 = vpop.f32.mrb[66].mxu0  ;;  %v2847_v29 = vpop.f32.mrb[66].mxu1  ;;  %v4494_v5 = vld [vmem:[#allocation18_spill] sm:$0xff] }
 0x15f   :  { %v2234_v14 = vadd.f32 %v3767_v12, %v1961_v17  ;;  %v1963_v51 = vsel %vm1863_vm3, %v1320_v27, -inf  ;;  %v1981_v0 = vsel %vm1863_vm3, %v2846_v41, -inf  ;;  %v1984_v47 = vsel %vm1863_vm3, %v2747_v56, -inf  ;;  %v1323_v53 = vpop.f32.mrb[67].mxu0  ;;  %v1723_v26 = vpop.f32.mrb[67].mxu1  ;;  %v4496_v56 = vld [vmem:[#allocation19_spill] sm:$0xff] }
 0x160   :  { %2333 = vst.msk [vmem:[%s4426_s3 + $0x60] sm:$0xff] %vm1863_vm3, %v2283_v58  ;;  %v2281_v43 = vmax.f32 %v2231_v28, 0.0  ;;  %v2232_v8 = vadd.f32 %v3767_v12, %v1947_v35  ;;  %v1964_v39 = vmax.f32 %v3691_v59, %v1963_v51  ;;  %v1980_v45 = vmax.f32 %v1978_v57, %v3746_v9  ;;  %v4495_v58 = vld [vmem:[#allocation47_spill] sm:$0xff] }
 0x161   :  { %v2284_v19 = vmax.f32 %v2234_v14, 0.0  ;;  %v1985_v52 = vmax.f32 %v3754_v37, %v1984_v47  ;;  %v1967_v54 = vsel %vm1863_vm3, %v1720_v62, -inf  ;;  %v1970_v48 = vsel %vm1863_vm3, %v1323_v53, -inf  ;;  %v4493_v37 = vld [vmem:[#allocation16_spill] sm:$0xff] }
 0x162   :  { %2331 = vst.msk [vmem:[%s4426_s3 + $0x50] sm:$0xff] %vm1863_vm3, %v2281_v43  ;;  %v2282_v23 = vmax.f32 %v2232_v8, 0.0  ;;  %v1982_v7 = vmax.f32 %v1980_v45, %v1981_v0  ;;  %v1966_v41 = vmax.f32 %v1964_v39, %v3695_v60  ;;  %v1971_v59 = vmax.f32 %v3703_v63, %v1970_v48 }
 0x163   :  { %v4002_v9 = vsel %vm1863_vm3, %v4492_v38, -inf  ;;  %v4006_v17 = vsel %vm1863_vm3, %v4493_v37, -inf  ;;  %v4010_v30 = vsel %vm1863_vm3, %v4494_v5, -inf  ;;  %2334 = vst.msk [vmem:[%s4426_s3 + $0x68] sm:$0xff] %vm1863_vm3, %v2284_v19  ;;  %v1987_v60 = vmax.f32 %v1985_v52, %v3762_v11 }
 0x164   :  { %2332 = vst.msk [vmem:[%s4426_s3 + $0x58] sm:$0xff] %vm1863_vm3, %v2282_v23  ;;  %v2237_v63 = vadd.f32 %v3767_v12, %v1982_v7  ;;  %v1968_v27 = vmax.f32 %v1966_v41, %v1967_v54  ;;  %v1988_v62 = vsel %vm1863_vm3, %v2847_v29, -inf  ;;  %v1973_v28 = vmax.f32 %v1971_v59, %v4495_v58  ;;  %v2750_v35 = vpop.f32.mrb[68].mxu0  ;;  %v2850_v57 = vpop.f32.mrb[68].mxu1 }
 0x165   :  { %v4026_v14 = vsel %vm1863_vm3, %v4496_v56, -inf  ;;  %v1989_v51 = vmax.f32 %v1987_v60, %v1988_v62  ;;  %v1974_v11 = vsel %vm1863_vm3, %v1723_v26, -inf  ;;  %v2005_v0 = vsel %vm1863_vm3, %v2750_v35, -inf  ;;  %v1336_v47 = vpop.f32.mrb[69].mxu0  ;;  %v1736_v53 = vpop.f32.mrb[69].mxu1 }
 0x166   :  { %v2287_v43 = vmax.f32 %v2237_v63, 0.0  ;;  %v2235_v8 = vadd.f32 %v3767_v12, %v1968_v27  ;;  %v1975_v39 = vmax.f32 %v1973_v28, %v1974_v11  ;;  %v2006_v29 = vmax.f32 %v3779_v36, %v2005_v0  ;;  %v2751_v45 = vpop.f32.mrb[70].mxu0  ;;  %v2851_v19 = vpop.f32.mrb[70].mxu1  ;;  %v4497_v28 = vld [vmem:[#allocation20_spill] sm:$0xff] }
 0x167   :  { %v2238_v52 = vadd.f32 %v3767_v12, %v1989_v51  ;;  %v1991_v54 = vsel %vm1863_vm3, %v1336_v47, -inf  ;;  %v2009_v48 = vsel %vm1863_vm3, %v2850_v57, -inf  ;;  %v2012_v26 = vsel %vm1863_vm3, %v2751_v45, -inf  ;;  %v1339_v23 = vpop.f32.mrb[71].mxu0  ;;  %v1739_v7 = vpop.f32.mrb[71].mxu1  ;;  %v4499_v57 = vld [vmem:[#allocation22_spill] sm:$0xff] }
 0x168   :  { %2337 = vst.msk [vmem:[%s4426_s3 + $0x80] sm:$0xff] %vm1863_vm3, %v2287_v43  ;;  %v2285_v41 = vmax.f32 %v2235_v8, 0.0  ;;  %v2236_v36 = vadd.f32 %v3767_v12, %v1975_v39  ;;  %v1992_v59 = vmax.f32 %v3728_v61, %v1991_v54  ;;  %v2008_v38 = vmax.f32 %v2006_v29, %v3787_v4  ;;  %v4500_v43 = vld [vmem:[#allocation23_spill] sm:$0xff] }
 0x169   :  { %v2288_v37 = vmax.f32 %v2238_v52, 0.0  ;;  %v2013_v5 = vmax.f32 %v3792_v18, %v2012_v26  ;;  %v1995_v60 = vsel %vm1863_vm3, %v1736_v53, -inf  ;;  %v1998_v63 = vsel %vm1863_vm3, %v1339_v23, -inf  ;;  %v4498_v18 = vld [vmem:[#allocation21_spill] sm:$0xff] }
 0x16a   :  { %2335 = vst.msk [vmem:[%s4426_s3 + $0x70] sm:$0xff] %vm1863_vm3, %v2285_v41  ;;  %v2286_v27 = vmax.f32 %v2236_v36, 0.0  ;;  %v2010_v62 = vmax.f32 %v2008_v38, %v2009_v48  ;;  %v1994_v58 = vmax.f32 %v1992_v59, %v3732_v2  ;;  %v1999_v61 = vmax.f32 %v3750_v10, %v1998_v63 }
 0x16b   :  { %v4054_v4 = vsel %vm1863_vm3, %v4497_v28, -inf  ;;  %v4058_v35 = vsel %vm1863_vm3, %v4498_v18, -inf  ;;  %v4062_v56 = vsel %vm1863_vm3, %v4499_v57, -inf  ;;  %2338 = vst.msk [vmem:[%s4426_s3 + $0x88] sm:$0xff] %vm1863_vm3, %v2288_v37  ;;  %v2015_v2 = vmax.f32 %v2013_v5, %v3801_v33 }
 0x16c   :  { %2336 = vst.msk [vmem:[%s4426_s3 + $0x78] sm:$0xff] %vm1863_vm3, %v2286_v27  ;;  %v2241_v10 = vadd.f32 %v3767_v12, %v2010_v62  ;;  %v1996_v51 = vmax.f32 %v1994_v58, %v1995_v60  ;;  %v2016_v11 = vsel %vm1863_vm3, %v2851_v19, -inf  ;;  %v2001_v0 = vmax.f32 %v1999_v61, %v3758_v42  ;;  %v2754_v47 = vpop.f32.mrb[72].mxu0  ;;  %v2854_v53 = vpop.f32.mrb[72].mxu1 }
 0x16d   :  { %v4078_v8 = vsel %vm1863_vm3, %v4500_v43, -inf  ;;  %v2017_v39 = vmax.f32 %v2015_v2, %v2016_v11  ;;  %v2002_v33 = vsel %vm1863_vm3, %v1739_v7, -inf  ;;  %v2033_v29 = vsel %vm1863_vm3, %v2754_v47, -inf  ;;  %v1352_v45 = vpop.f32.mrb[73].mxu0  ;;  %v1752_v52 = vpop.f32.mrb[73].mxu1  ;;  %v4501_v2 = vld [vmem:[#allocation25_spill] sm:$0xff] }
 0x16e   :  { %v2291_v54 = vmax.f32 %v2241_v10, 0.0  ;;  %v2239_v48 = vadd.f32 %v3767_v12, %v1996_v51  ;;  %v2003_v26 = vmax.f32 %v2001_v0, %v2002_v33  ;;  %v2034_v19 = vmax.f32 %v3828_v21, %v2033_v29  ;;  %v2755_v42 = vpop.f32.mrb[74].mxu0  ;;  %v2855_v23 = vpop.f32.mrb[74].mxu1  ;;  %v4503_v51 = vld [vmem:[#allocation26_spill] sm:$0xff]  ;;  %v4505_v29 = vld [vmem:[#allocation27_spill] sm:$0xff] }
 0x16f   :  { %v2242_v41 = vadd.f32 %v3767_v12, %v2017_v39  ;;  %v2019_v36 = vsel %vm1863_vm3, %v1352_v45, -inf  ;;  %v2037_v59 = vsel %vm1863_vm3, %v2854_v53, -inf  ;;  %v2040_v7 = vsel %vm1863_vm3, %v2755_v42, -inf  ;;  %v1355_v38 = vpop.f32.mrb[75].mxu0  ;;  %v1755_v37 = vpop.f32.mrb[75].mxu1  ;;  %v4504_v53 = vld [vmem:[#allocation50_spill] sm:$0xff] }
 0x170   :  { %2341 = vst.msk [vmem:[%s4426_s3 + $0xa0] sm:$0xff] %vm1863_vm3, %v2291_v54  ;;  %v2289_v5 = vmax.f32 %v2239_v48, 0.0  ;;  %v2240_v21 = vadd.f32 %v3767_v12, %v2003_v26  ;;  %v2020_v60 = vmax.f32 %v3771_v13, %v2019_v36  ;;  %v2036_v63 = vmax.f32 %v2034_v19, %v3832_v3 }
 0x171   :  { %v2292_v27 = vmax.f32 %v2242_v41, 0.0  ;;  %v2041_v62 = vmax.f32 %v3851_v40, %v2040_v7  ;;  %v2023_v58 = vsel %vm1863_vm3, %v1752_v52, -inf  ;;  %v2026_v61 = vsel %vm1863_vm3, %v1355_v38, -inf  ;;  %v4502_v40 = vld [vmem:[#allocation24_spill] sm:$0xff] }
 0x172   :  { %2339 = vst.msk [vmem:[%s4426_s3 + $0x90] sm:$0xff] %vm1863_vm3, %v2289_v5  ;;  %v2290_v28 = vmax.f32 %v2240_v21, 0.0  ;;  %v2038_v18 = vmax.f32 %v2036_v63, %v2037_v59  ;;  %v2022_v57 = vmax.f32 %v2020_v60, %v3775_v15  ;;  %v2027_v13 = vmax.f32 %v3783_v16, %v2026_v61 }
 0x173   :  { %v4106_v3 = vsel %vm1863_vm3, %v4501_v2, -inf  ;;  %v4110_v10 = vsel %vm1863_vm3, %v4502_v40, -inf  ;;  %v4114_v11 = vsel %vm1863_vm3, %v4503_v51, -inf  ;;  %2342 = vst.msk [vmem:[%s4426_s3 + $0xa8] sm:$0xff] %vm1863_vm3, %v2292_v27  ;;  %v2043_v15 = vmax.f32 %v2041_v62, %v3857_v24  ;;  %v4506_v27 = vld [vmem:[#allocation51_spill] sm:$0xff]  ;;  %v4507_v40 = vld [vmem:[#allocation52_spill] sm:$0xff] }
 0x174   :  { %2340 = vst.msk [vmem:[%s4426_s3 + $0x98] sm:$0xff] %vm1863_vm3, %v2290_v28  ;;  %v2245_v16 = vadd.f32 %v3767_v12, %v2038_v18  ;;  %v2024_v0 = vmax.f32 %v2022_v57, %v2023_v58  ;;  %v2044_v47 = vsel %vm1863_vm3, %v2855_v23, -inf  ;;  %v2029_v43 = vmax.f32 %v2027_v13, %v4504_v53  ;;  %v2758_v39 = vpop.f32.mrb[76].mxu0  ;;  %v2858_v33 = vpop.f32.mrb[76].mxu1 }
 0x175   :  { %v4130_v45 = vsel %vm1863_vm3, %v4505_v29, -inf  ;;  %v2045_v52 = vmax.f32 %v2043_v15, %v2044_v47  ;;  %v2030_v24 = vsel %vm1863_vm3, %v1755_v37, -inf  ;;  %v2061_v54 = vsel %vm1863_vm3, %v2758_v39, -inf  ;;  %v1368_v48 = vpop.f32.mrb[77].mxu0  ;;  %v1768_v26 = vpop.f32.mrb[77].mxu1  ;;  %v4510_v47 = vld [vmem:[#allocation30_spill] sm:$0xff] }
 0x176   :  { %v2295_v19 = vmax.f32 %v2245_v16, 0.0  ;;  %v2243_v42 = vadd.f32 %v3767_v12, %v2024_v0  ;;  %v2031_v41 = vmax.f32 %v2029_v43, %v2030_v24  ;;  %v2062_v23 = vmax.f32 %v3899_v22, %v2061_v54  ;;  %v2759_v36 = vpop.f32.mrb[78].mxu0  ;;  %v2859_v59 = vpop.f32.mrb[78].mxu1  ;;  %v4508_v16 = vld [vmem:[#allocation28_spill] sm:$0xff]  ;;  %v4511_v54 = vld [vmem:[#allocation31_spill] sm:$0xff] }
 0x177   :  { %v2246_v7 = vadd.f32 %v3767_v12, %v2045_v52  ;;  %v2047_v38 = vsel %vm1863_vm3, %v1368_v48, -inf  ;;  %v2065_v5 = vsel %vm1863_vm3, %v2858_v33, -inf  ;;  %v2068_v37 = vsel %vm1863_vm3, %v2759_v36, -inf  ;;  %v1371_v21 = vpop.f32.mrb[79].mxu0  ;;  %v1771_v60 = vpop.f32.mrb[79].mxu1 }
 0x178   :  { %2345 = vst.msk [vmem:[%s4426_s3 + $0xc0] sm:$0xff] %vm1863_vm3, %v2295_v19  ;;  %v2293_v63 = vmax.f32 %v2243_v42, 0.0  ;;  %v2244_v22 = vadd.f32 %v3767_v12, %v2031_v41  ;;  %v2048_v62 = vmax.f32 %v4506_v27, %v2047_v38  ;;  %v2064_v58 = vmax.f32 %v2062_v23, %v3903_v32 }
 0x179   :  { %v2296_v61 = vmax.f32 %v2246_v7, 0.0  ;;  %v2069_v28 = vmax.f32 %v3937_v31, %v2068_v37  ;;  %v2051_v18 = vsel %vm1863_vm3, %v1768_v26, -inf  ;;  %v2054_v57 = vsel %vm1863_vm3, %v1371_v21, -inf  ;;  %v4509_v31 = vld [vmem:[#allocation29_spill] sm:$0xff] }
 0x17a   :  { %2343 = vst.msk [vmem:[%s4426_s3 + $0xb0] sm:$0xff] %vm1863_vm3, %v2293_v63  ;;  %v2294_v13 = vmax.f32 %v2244_v22, 0.0  ;;  %v2066_v2 = vmax.f32 %v2064_v58, %v2065_v5  ;;  %v2050_v51 = vmax.f32 %v2048_v62, %v4507_v40  ;;  %v2055_v15 = vmax.f32 %v3838_v1, %v2054_v57 }
 0x17b   :  { %v4158_v32 = vsel %vm1863_vm3, %v4508_v16, -inf  ;;  %v4162_v0 = vsel %vm1863_vm3, %v4509_v31, -inf  ;;  %v4166_v53 = vsel %vm1863_vm3, %v4510_v47, -inf  ;;  %2346 = vst.msk [vmem:[%s4426_s3 + $0xc8] sm:$0xff] %vm1863_vm3, %v2296_v61  ;;  %v2071_v43 = vmax.f32 %v2069_v28, %v3954_v20  ;;  %v4514_v16 = vld [vmem:[#allocation34_spill] sm:$0xff] }
 0x17c   :  { %2344 = vst.msk [vmem:[%s4426_s3 + $0xb8] sm:$0xff] %vm1863_vm3, %v2294_v13  ;;  %v2249_v1 = vadd.f32 %v3767_v12, %v2066_v2  ;;  %v2052_v39 = vmax.f32 %v2050_v51, %v2051_v18  ;;  %v2072_v33 = vsel %vm1863_vm3, %v2859_v59, -inf  ;;  %v2057_v29 = vmax.f32 %v2055_v15, %v3842_v49  ;;  %v2762_v52 = vpop.f32.mrb[80].mxu0  ;;  %v2862_v24 = vpop.f32.mrb[80].mxu1  ;;  %v4512_v51 = vld [vmem:[#allocation33_spill] sm:$0xff] }
 0x17d   :  { %v4182_v48 = vsel %vm1863_vm3, %v4511_v54, -inf  ;;  %v2073_v26 = vmax.f32 %v2071_v43, %v2072_v33  ;;  %v2058_v20 = vsel %vm1863_vm3, %v1771_v60, -inf  ;;  %v2089_v19 = vsel %vm1863_vm3, %v2762_v52, -inf  ;;  %v1384_v42 = vpop.f32.mrb[81].mxu0  ;;  %v1784_v41 = vpop.f32.mrb[81].mxu1 }
 0x17e   :  { %v2299_v23 = vmax.f32 %v2249_v1, 0.0  ;;  %v2247_v36 = vadd.f32 %v3767_v12, %v2052_v39  ;;  %v2059_v7 = vmax.f32 %v2057_v29, %v2058_v20  ;;  %v2090_v59 = vmax.f32 %v3974_v44, %v2089_v19  ;;  %v2763_v49 = vpop.f32.mrb[82].mxu0  ;;  %v2863_v38 = vpop.f32.mrb[82].mxu1  ;;  %v4515_v29 = vld [vmem:[#allocation35_spill] sm:$0xff] }
 0x17f   :  { %v2250_v5 = vadd.f32 %v3767_v12, %v2073_v26  ;;  %v2075_v37 = vsel %vm1863_vm3, %v1384_v42, -inf  ;;  %v2093_v21 = vsel %vm1863_vm3, %v2862_v24, -inf  ;;  %v2096_v60 = vsel %vm1863_vm3, %v2763_v49, -inf  ;;  %v1387_v63 = vpop.f32.mrb[83].mxu0  ;;  %v1787_v22 = vpop.f32.mrb[83].mxu1 }
 0x180   :  { %2349 = vst.msk [vmem:[%s4426_s3 + $0xe0] sm:$0xff] %vm1863_vm3, %v2299_v23  ;;  %v2297_v27 = vmax.f32 %v2247_v36, 0.0  ;;  %v2248_v44 = vadd.f32 %v3767_v12, %v2059_v7  ;;  %v2076_v62 = vmax.f32 %v3879_v50, %v2075_v37  ;;  %v2092_v58 = vmax.f32 %v2090_v59, %v4006_v17 }
 0x181   :  { %v2300_v61 = vmax.f32 %v2250_v5, 0.0  ;;  %v2097_v28 = vmax.f32 %v4026_v14, %v2096_v60  ;;  %v2079_v18 = vsel %vm1863_vm3, %v1784_v41, -inf  ;;  %v2082_v57 = vsel %vm1863_vm3, %v1387_v63, -inf  ;;  %v4513_v14 = vld [vmem:[#allocation32_spill] sm:$0xff] }
 0x182   :  { %2347 = vst.msk [vmem:[%s4426_s3 + $0xd0] sm:$0xff] %vm1863_vm3, %v2297_v27  ;;  %v2298_v13 = vmax.f32 %v2248_v44, 0.0  ;;  %v2094_v2 = vmax.f32 %v2092_v58, %v2093_v21  ;;  %v2078_v40 = vmax.f32 %v2076_v62, %v3889_v55  ;;  %v2083_v50 = vmax.f32 %v3912_v34, %v2082_v57  ;;  %v4517_v57 = vld [vmem:[#allocation37_spill] sm:$0xff] }
 0x183   :  { %v4210_v17 = vsel %vm1863_vm3, %v4512_v51, -inf  ;;  %v4214_v15 = vsel %vm1863_vm3, %v4513_v14, -inf  ;;  %v4218_v31 = vsel %vm1863_vm3, %v4514_v16, -inf  ;;  %2350 = vst.msk [vmem:[%s4426_s3 + $0xe8] sm:$0xff] %vm1863_vm3, %v2300_v61  ;;  %v2099_v55 = vmax.f32 %v2097_v28, %v4054_v4 }
 0x184   :  { %2348 = vst.msk [vmem:[%s4426_s3 + $0xd8] sm:$0xff] %vm1863_vm3, %v2298_v13  ;;  %v2253_v34 = vadd.f32 %v3767_v12, %v2094_v2  ;;  %v2080_v47 = vmax.f32 %v2078_v40, %v2079_v18  ;;  %v2100_v43 = vsel %vm1863_vm3, %v2863_v38, -inf  ;;  %v2085_v1 = vmax.f32 %v2083_v50, %v3918_v25  ;;  %v2766_v39 = vpop.f32.mrb[84].mxu0  ;;  %v2866_v33 = vpop.f32.mrb[84].mxu1  ;;  %v4516_v18 = vld [vmem:[#allocation36_spill] sm:$0xff]  ;;  %v4518_v13 = vld [vmem:[#allocation38_spill] sm:$0xff] }
 0x185   :  { %v4234_v52 = vsel %vm1863_vm3, %v4515_v29, -inf  ;;  %v2101_v24 = vmax.f32 %v2099_v55, %v2100_v43  ;;  %v2086_v4 = vsel %vm1863_vm3, %v1787_v22, -inf  ;;  %v2117_v54 = vsel %vm1863_vm3, %v2766_v39, -inf  ;;  %v1400_v26 = vpop.f32.mrb[85].mxu0  ;;  %v1800_v20 = vpop.f32.mrb[85].mxu1  ;;  %v4519_v55 = vld [vmem:[#allocation39_spill] sm:$0xff] }
 0x186   :  { %v2303_v19 = vmax.f32 %v2253_v34, 0.0  ;;  %v2251_v42 = vadd.f32 %v3767_v12, %v2080_v47  ;;  %v2087_v41 = vmax.f32 %v2085_v1, %v2086_v4  ;;  %v2118_v23 = vmax.f32 %v4078_v8, %v2117_v54  ;;  %v2767_v25 = vpop.f32.mrb[86].mxu0  ;;  %v2867_v36 = vpop.f32.mrb[86].mxu1 }
 0x187   :  { %v2254_v7 = vadd.f32 %v3767_v12, %v2101_v24  ;;  %v2103_v59 = vsel %vm1863_vm3, %v1400_v26, -inf  ;;  %v2121_v49 = vsel %vm1863_vm3, %v2866_v33, -inf  ;;  %v2124_v38 = vsel %vm1863_vm3, %v2767_v25, -inf  ;;  %v1403_v5 = vpop.f32.mrb[87].mxu0  ;;  %v1803_v37 = vpop.f32.mrb[87].mxu1 }
 0x188   :  { %2353 = vst.msk [vmem:[%s4426_s3 + $0x100] sm:$0xff] %vm1863_vm3, %v2303_v19  ;;  %v2301_v21 = vmax.f32 %v2251_v42, 0.0  ;;  %v2252_v8 = vadd.f32 %v3767_v12, %v2087_v41  ;;  %v2104_v60 = vmax.f32 %v3958_v6, %v2103_v59  ;;  %v2120_v63 = vmax.f32 %v2118_v23, %v4110_v10 }
 0x189   :  { %v2304_v22 = vmax.f32 %v2254_v7, 0.0  ;;  %v2125_v27 = vmax.f32 %v4130_v45, %v2124_v38  ;;  %v2107_v44 = vsel %vm1863_vm3, %v1800_v20, -inf  ;;  %v2110_v62 = vsel %vm1863_vm3, %v1403_v5, -inf }
 0x18a   :  { %2351 = vst.msk [vmem:[%s4426_s3 + $0xf0] sm:$0xff] %vm1863_vm3, %v2301_v21  ;;  %v2302_v58 = vmax.f32 %v2252_v8, 0.0  ;;  %v2122_v61 = vmax.f32 %v2120_v63, %v2121_v49  ;;  %v2106_v28 = vmax.f32 %v2104_v60, %v3962_v46  ;;  %v2111_v6 = vmax.f32 %v4002_v9, %v2110_v62  ;;  %v4520_v60 = vld [vmem:[#allocation41_spill] sm:$0xff] }
 0x18b   :  { %v2154_v10 = vsel %vm1863_vm3, %v4516_v18, -inf  ;;  %v4264_v45 = vsel %vm1863_vm3, %v4517_v57, -inf  ;;  %v4268_v2 = vsel %vm1863_vm3, %v4518_v13, -inf  ;;  %2354 = vst.msk [vmem:[%s4426_s3 + $0x108] sm:$0xff] %vm1863_vm3, %v2304_v22  ;;  %v2127_v46 = vmax.f32 %v2125_v27, %v4158_v32  ;;  %v4522_v22 = vld [vmem:[#allocation43_spill] sm:$0xff] }
 0x18c   :  { %2352 = vst.msk [vmem:[%s4426_s3 + $0xf8] sm:$0xff] %vm1863_vm3, %v2302_v58  ;;  %v2257_v9 = vadd.f32 %v3767_v12, %v2122_v61  ;;  %v2108_v40 = vmax.f32 %v2106_v28, %v2107_v44  ;;  %v2128_v50 = vsel %vm1863_vm3, %v2867_v36, -inf  ;;  %v2113_v51 = vmax.f32 %v2111_v6, %v4010_v30  ;;  %v2770_v14 = vpop.f32.mrb[88].mxu0  ;;  %v2870_v16 = vpop.f32.mrb[88].mxu1  ;;  %v4523_v6 = vld [vmem:[#allocation44_spill] sm:$0xff] }
 0x18d   :  { %v4284_v34 = vsel %vm1863_vm3, %v4519_v55, -inf  ;;  %v2129_v47 = vmax.f32 %v2127_v46, %v2128_v50  ;;  %v2114_v32 = vsel %vm1863_vm3, %v1803_v37, -inf  ;;  %v2145_v43 = vsel %vm1863_vm3, %v2770_v14, -inf  ;;  %v1416_v1 = vpop.f32.mrb[89].mxu0  ;;  %v1816_v39 = vpop.f32.mrb[89].mxu1 }
 0x18e   :  { %v2307_v33 = vmax.f32 %v2257_v9, 0.0  ;;  %v2255_v29 = vadd.f32 %v3767_v12, %v2108_v40  ;;  %v2115_v24 = vmax.f32 %v2113_v51, %v2114_v32  ;;  %v2146_v4 = vmax.f32 %v4182_v48, %v2145_v43  ;;  %v2771_v30 = vpop.f32.mrb[90].mxu0  ;;  %v2871_v54 = vpop.f32.mrb[90].mxu1 }
 0x18f   :  { %v2258_v26 = vadd.f32 %v3767_v12, %v2129_v47  ;;  %v2131_v20 = vsel %vm1863_vm3, %v1416_v1, -inf  ;;  %v2149_v19 = vsel %vm1863_vm3, %v2870_v16, -inf  ;;  %v2152_v42 = vsel %vm1863_vm3, %v2771_v30, -inf  ;;  %v1419_v41 = vpop.f32.mrb[91].mxu0  ;;  %v1819_v23 = vpop.f32.mrb[91].mxu1 }
 0x190   :  { %2357 = vst.msk [vmem:[%s4426_s3 + $0x120] sm:$0xff] %vm1863_vm3, %v2307_v33  ;;  %v2305_v25 = vmax.f32 %v2255_v29, 0.0  ;;  %v2256_v48 = vadd.f32 %v3767_v12, %v2115_v24  ;;  %v2132_v36 = vmax.f32 %v4058_v35, %v2131_v20  ;;  %v2148_v7 = vmax.f32 %v2146_v4, %v4214_v15 }
 0x191   :  { %v2308_v59 = vmax.f32 %v2258_v26, 0.0  ;;  %v2153_v49 = vmax.f32 %v4234_v52, %v2152_v42  ;;  %v2135_v38 = vsel %vm1863_vm3, %v1816_v39, -inf  ;;  %v2138_v5 = vsel %vm1863_vm3, %v1419_v41, -inf  ;;  %v4521_v52 = vld [vmem:[#allocation40_spill] sm:$0xff] }
 0x192   :  { %2355 = vst.msk [vmem:[%s4426_s3 + $0x110] sm:$0xff] %vm1863_vm3, %v2305_v25  ;;  %v2306_v37 = vmax.f32 %v2256_v48, 0.0  ;;  %v2150_v21 = vmax.f32 %v2148_v7, %v2149_v19  ;;  %v2134_v8 = vmax.f32 %v2132_v36, %v4062_v56  ;;  %v2139_v35 = vmax.f32 %v4106_v3, %v2138_v5  ;;  %v4525_v25 = vld [vmem:[#allocation46_spill] sm:$0xff]  ;;  %v4526_v36 = vld [vmem:[#allocation48_spill] sm:$0xff] }
 0x193   :  { %v4312_v15 = vsel %vm1863_vm3, %v4520_v60, -inf  ;;  %v2175_v63 = vsel %vm1863_vm3, %v4521_v52, -inf  ;;  %v2179_v27 = vsel %vm1863_vm3, %v4522_v22, -inf  ;;  %2358 = vst.msk [vmem:[%s4426_s3 + $0x128] sm:$0xff] %vm1863_vm3, %v2308_v59  ;;  %v2155_v44 = vmax.f32 %v2153_v49, %v2154_v10 }
 0x194   :  { %2356 = vst.msk [vmem:[%s4426_s3 + $0x118] sm:$0xff] %vm1863_vm3, %v2306_v37  ;;  %v2261_v56 = vadd.f32 %v3767_v12, %v2150_v21  ;;  %v2136_v3 = vmax.f32 %v2134_v8, %v2135_v38  ;;  %v2156_v62 = vsel %vm1863_vm3, %v2871_v54, -inf  ;;  %v2141_v58 = vmax.f32 %v2139_v35, %v4114_v11  ;;  %v2774_v61 = vpop.f32.mrb[92].mxu0  ;;  %v2874_v28 = vpop.f32.mrb[92].mxu1  ;;  %v4527_v21 = vld [vmem:[#allocation49_spill] sm:$0xff] }
 0x195   :  { %v2182_v18 = vsel %vm1863_vm3, %v4523_v6, -inf  ;;  %v2157_v57 = vmax.f32 %v2155_v44, %v2156_v62  ;;  %v2142_v10 = vsel %vm1863_vm3, %v1819_v23, -inf  ;;  %v2173_v13 = vsel %vm1863_vm3, %v2774_v61, -inf  ;;  %v1432_v46 = vpop.f32.mrb[93].mxu0  ;;  %v1832_v9 = vpop.f32.mrb[93].mxu1  ;;  %v4524_v23 = vld [vmem:[#allocation45_spill] sm:$0xff] }
 0x196   :  { %v2311_v40 = vmax.f32 %v2261_v56, 0.0  ;;  %v2259_v50 = vadd.f32 %v3767_v12, %v2136_v3  ;;  %v2143_v51 = vmax.f32 %v2141_v58, %v2142_v10  ;;  %v2174_v14 = vmax.f32 %v4284_v34, %v2173_v13  ;;  %v2775_v16 = vpop.f32.mrb[94].mxu0  ;;  %v2875_v11 = vpop.f32.mrb[94].mxu1  ;;  %v2984_v13 = vld [vmem:[%s4425_s2] ss:$0 sm:$0xff] }
 0x197   :  { %v2262_v55 = vadd.f32 %v3767_v12, %v2157_v57  ;;  %v2159_v47 = vsel %vm1863_vm3, %v1432_v46, -inf  ;;  %v2177_v32 = vsel %vm1863_vm3, %v2874_v28, -inf  ;;  %v2180_v43 = vsel %vm1863_vm3, %v2775_v16, -inf  ;;  %v1435_v1 = vpop.f32.mrb[95].mxu0  ;;  %v1835_v39 = vpop.f32.mrb[95].mxu1 }
 0x198   :  { %2361 = vst.msk [vmem:[%s4426_s3 + $0x140] sm:$0xff] %vm1863_vm3, %v2311_v40  ;;  %v2309_v33 = vmax.f32 %v2259_v50, 0.0  ;;  %v2260_v34 = vadd.f32 %v3767_v12, %v2143_v51  ;;  %v2160_v29 = vmax.f32 %v4162_v0, %v2159_v47  ;;  %v2176_v24 = vmax.f32 %v2174_v14, %v2175_v63 }
 0x199   :  { %v2312_v4 = vmax.f32 %v2262_v55, 0.0  ;;  %v2181_v30 = vmax.f32 %v2179_v27, %v2180_v43  ;;  %v2163_v54 = vsel %vm1863_vm3, %v1832_v9, -inf  ;;  %v2166_v26 = vsel %vm1863_vm3, %v1435_v1, -inf }
 0x19a   :  { %2359 = vst.msk [vmem:[%s4426_s3 + $0x130] sm:$0xff] %vm1863_vm3, %v2309_v33  ;;  %v2310_v20 = vmax.f32 %v2260_v34, 0.0  ;;  %v2178_v19 = vmax.f32 %v2176_v24, %v2177_v32  ;;  %v2162_v42 = vmax.f32 %v2160_v29, %v4166_v53  ;;  %v2167_v41 = vmax.f32 %v4210_v17, %v2166_v26  ;;  %v4528_v32 = vld [vmem:[#allocation42_spill] sm:$0xff] }
 0x19b   :  { %v2200_v0 = vsel %vm1863_vm3, %v4524_v23, -inf  ;;  %v2203_v48 = vsel %vm1863_vm3, %v4525_v25, -inf  ;;  %v2207_v7 = vsel %vm1863_vm3, %v4526_v36, -inf  ;;  %2362 = vst.msk [vmem:[%s4426_s3 + $0x148] sm:$0xff] %vm1863_vm3, %v2312_v4  ;;  %v2183_v59 = vmax.f32 %v2181_v30, %v2182_v18 }
 0x19c   :  { %2360 = vst.msk [vmem:[%s4426_s3 + $0x138] sm:$0xff] %vm1863_vm3, %v2310_v20  ;;  %v2265_v53 = vadd.f32 %v3767_v12, %v2178_v19  ;;  %v2164_v17 = vmax.f32 %v2162_v42, %v2163_v54  ;;  %v2184_v49 = vsel %vm1863_vm3, %v2875_v11, -inf  ;;  %v2169_v38 = vmax.f32 %v2167_v41, %v4218_v31  ;;  %v2778_v5 = vpop.f32.mrb[96].mxu0  ;;  %v2878_v37 = vpop.f32.mrb[96].mxu1 }
 0x19d   :  { %v2210_v8 = vsel %vm1863_vm3, %v4527_v21, -inf  ;;  %v2185_v35 = vmax.f32 %v2183_v59, %v2184_v49  ;;  %v2170_v60 = vsel %vm1863_vm3, %v1835_v39, -inf  ;;  %v2201_v52 = vsel %vm1863_vm3, %v2778_v5, -inf  ;;  %v1448_v63 = vpop.f32.mrb[97].mxu0  ;;  %v1848_v22 = vpop.f32.mrb[97].mxu1 }
 0x19e   :  { %v2315_v27 = vmax.f32 %v2265_v53, 0.0  ;;  %v2263_v44 = vadd.f32 %v3767_v12, %v2164_v17  ;;  %v2171_v56 = vmax.f32 %v2169_v38, %v2170_v60  ;;  %v2202_v3 = vmax.f32 %v2200_v0, %v2201_v52  ;;  %v2779_v62 = vpop.f32.mrb[98].mxu0  ;;  %v2879_v58 = vpop.f32.mrb[98].mxu1 }
 0x19f   :  { %v2266_v31 = vadd.f32 %v3767_v12, %v2185_v35  ;;  %v2187_v61 = vsel %vm1863_vm3, %v1448_v63, -inf  ;;  %v2205_v28 = vsel %vm1863_vm3, %v2878_v37, -inf  ;;  %v2208_v6 = vsel %vm1863_vm3, %v2779_v62, -inf  ;;  %v1451_v18 = vpop.f32.mrb[99].mxu0  ;;  %v1851_v57 = vpop.f32.mrb[99].mxu1 }
 0x1a0   :  { %2365 = vst.msk [vmem:[%s4426_s3 + $0x160] sm:$0xff] %vm1863_vm3, %v2315_v27  ;;  %v2313_v10 = vmax.f32 %v2263_v44, 0.0  ;;  %v2264_v46 = vadd.f32 %v2984_v13, %v2171_v56  ;;  %v2188_v12 = vmax.f32 %v4264_v45, %v2187_v61  ;;  %v2204_v9 = vmax.f32 %v2202_v3, %v2203_v48 }
 0x1a1   :  { %v2316_v40 = vmax.f32 %v2266_v31, 0.0  ;;  %v2209_v50 = vmax.f32 %v2207_v7, %v2208_v6  ;;  %v2191_v51 = vsel %vm1863_vm3, %v1848_v22, -inf  ;;  %v2194_v14 = vsel %vm1863_vm3, %v1451_v18, -inf }
 0x1a2   :  { %2363 = vst.msk [vmem:[%s4426_s3 + $0x150] sm:$0xff] %vm1863_vm3, %v2313_v10  ;;  %v2314_v16 = vmax.f32 %v2264_v46, 0.0  ;;  %v2206_v11 = vmax.f32 %v2204_v9, %v2205_v28  ;;  %v2190_v55 = vmax.f32 %v2188_v12, %v4268_v2  ;;  %v2195_v47 = vmax.f32 %v4312_v15, %v2194_v14 }
 0x1a3   :  { %v2196_v45 = vsel %vm1863_vm3, %v4528_v32, -inf  ;;  %2366 = vst.msk [vmem:[%s4426_s3 + $0x168] sm:$0xff] %vm1863_vm3, %v2316_v40  ;;  %v2211_v43 = vmax.f32 %v2209_v50, %v2210_v8  ;;  %v2212_v2 = vsel %vm1863_vm3, %v2879_v58, -inf  ;;  %v2198_v34 = vsel %vm1863_vm3, %v1851_v57, -inf }
 0x1a4   :  { %2364 = vst.msk [vmem:[%s4426_s3 + $0x158] sm:$0xff] %vm1863_vm3, %v2314_v16  ;;  %v2269_v1 = vadd.f32 %v2984_v13, %v2206_v11  ;;  %v2192_v39 = vmax.f32 %v2190_v55, %v2191_v51  ;;  %v2197_v33 = vmax.f32 %v2195_v47, %v2196_v45 }
 0x1a5   :  { %v2213_v15 = vmax.f32 %v2211_v43, %v2212_v2 }
 0x1a6   :  { %v2319_v29 = vmax.f32 %v2269_v1, 0.0  ;;  %v2267_v24 = vadd.f32 %v2984_v13, %v2192_v39  ;;  %v2199_v4 = vmax.f32 %v2197_v33, %v2198_v34 }
 0x1a7   :  { %v2270_v30 = vadd.f32 %v2984_v13, %v2213_v15 }
 0x1a8   :  { %2369 = vst.msk [vmem:[%s4426_s3 + $0x180] sm:$0xff] %vm1863_vm3, %v2319_v29  ;;  %v2317_v54 = vmax.f32 %v2267_v24, 0.0  ;;  %v2268_v26 = vadd.f32 %v2984_v13, %v2199_v4 }
 0x1a9   :  { %v2320_v20 = vmax.f32 %v2270_v30, 0.0 }
 0x1aa   :  { %2367 = vst.msk [vmem:[%s4426_s3 + $0x170] sm:$0xff] %vm1863_vm3, %v2317_v54  ;;  %v2318_v19 = vmax.f32 %v2268_v26, 0.0 }
 0x1ab   :  { %2370 = vst.msk [vmem:[%s4426_s3 + $0x188] sm:$0xff] %vm1863_vm3, %v2320_v20 }
 0x1ac   :  { %2368 = vst.msk [vmem:[%s4426_s3 + $0x178] sm:$0xff] %vm1863_vm3, %v2318_v19 }

// kernel: char_cnn_forward.4
= control target key start
LH: loop header
LB: loop body
LE: loop exit
PB: predicated region body
PF: predicated region fallthrough
CT: control target
= control target key end

     0   :  { %v1095_v0 = vmov 0   ;;  %vm395_vm0 = vcmask 130048   ;;  %vm737_vm1 = vcmask 261120   ;;  %s1551_s1 = inlined_call_operand.vmem [shape: bf16[144,32], index: 1, kind: input, shape index: {}]   ;;  %s1552_s0 = inlined_call_operand.vmem [shape: bf16[4,112,144], index: 0, kind: input, shape index: {}]   ;;  %s1553_s2 = inlined_call_operand.vmem [shape: f32[1,32], index: 2, kind: input, shape index: {}]   ;;  %s1554_s3 = inlined_call_operand.vmem [shape: f32[112,32], index: 3, kind: output, shape index: {}]  }
   0x1   :  { %480 = vmatprep.subr.bf16.mxu0 %v1095_v0  ;;  %983 = vmatprep.subr.bf16.mxu1 %v1095_v0  ;;  %v1002_v1 = vld [vmem:[%s1551_s1] sm:$0xff]   ;;  %v1003_v2 = vld [vmem:[%s1551_s1 + $0x8] sm:$0xff]   ;;  %v1004_v3 = vld [vmem:[%s1551_s1 + $0x10] sm:$0xff]  }
   0x2   :  { %481 = vmatpush1.bf16.msra.mxu0 %v1002_v1  ;;  %992 = vmatpush1.bf16.msra.mxu1 %v1002_v1  ;;  %v1005_v4 = vld [vmem:[%s1551_s1 + $0x18] sm:$0xff]   ;;  %v1013_v5 = vld [vmem:[%s1552_s0 + $0x4] ss:$8 sps:$4 sm:$0xff]   ;;  %v1008_v9 = vld [vmem:[%s1551_s1 + $0x30] sm:$0xff]  }
   0x3   :  { %482 = vmatprep.subr.bf16.mxu0 %v1095_v0  ;;  %984 = vmatprep.subr.bf16.mxu1 %v1095_v0  ;;  %v1016_v6 = vld [vmem:[%s1552_s0 + $0xe4] ss:$8 sps:$4 sm:$0xff]   ;;  %v1009_v10 = vld [vmem:[%s1551_s1 + $0x38] sm:$0xff]   ;;  %v1011_v12 = vld [vmem:[%s1552_s0] ss:$8 sps:$4 sm:$0xff]  }
   0x4   :  { %954 = vmatprep.mubr.msk.bf16.mxu0 %vm395_vm0, %v1013_v5  ;;  %968 = vmatprep.mubr.msk.bf16.mxu1 %vm395_vm0, %v1016_v6  ;;  %v1006_v7 = vld [vmem:[%s1551_s1 + $0x20] sm:$0xff]   ;;  %v1007_v8 = vld [vmem:[%s1551_s1 + $0x28] sm:$0xff]   ;;  %v1017_v14 = vld [vmem:[%s1552_s0 + $0x14] ss:$8 sps:$4 sm:$0xff]  }
   0x5   :  { %v1010_v11 = vld [vmem:[%s1551_s1 + $0x40] sm:$0xff]   ;;  %v1020_v15 = vld [vmem:[%s1552_s0 + $0xf4] ss:$8 sps:$4 sm:$0xff]   ;;  %v1019_v16 = vld [vmem:[%s1552_s0 + $0x10] ss:$8 sps:$4 sm:$0xff]  }
   0x6   :  { %483 = vmatpush1.bf16.msra.mxu0 %v1003_v2  ;;  %993 = vmatpush1.bf16.msra.mxu1 %v1003_v2  ;;  %v1014_v13 = vld [vmem:[%s1552_s0 + $0xe0] ss:$8 sps:$4 sm:$0xff]   ;;  %v1022_v17 = vld [vmem:[%s1552_s0 + $0xf0] ss:$8 sps:$4 sm:$0xff]   ;;  %v1023_v18 = vld [vmem:[%s1552_s0 + $0x24] ss:$8 sps:$4 sm:$0xff]  }
   0x7   :  { %484 = vmatprep.subr.bf16.mxu0 %v1095_v0  ;;  %985 = vmatprep.subr.bf16.mxu1 %v1095_v0  ;;  %v1026_v19 = vld [vmem:[%s1552_s0 + $0x104] ss:$8 sps:$4 sm:$0xff]   ;;  %v1025_v20 = vld [vmem:[%s1552_s0 + $0x20] ss:$8 sps:$4 sm:$0xff]   ;;  %v1029_v22 = vld [vmem:[%s1552_s0 + $0x34] ss:$8 sps:$4 sm:$0xff]  }
   0x8   :  { %v1028_v21 = vld [vmem:[%s1552_s0 + $0x100] ss:$8 sps:$4 sm:$0xff]   ;;  %v1032_v23 = vld [vmem:[%s1552_s0 + $0x114] ss:$8 sps:$4 sm:$0xff]   ;;  %v1031_v24 = vld [vmem:[%s1552_s0 + $0x30] ss:$8 sps:$4 sm:$0xff]  }
   0x9   :  { %v1034_v25 = vld [vmem:[%s1552_s0 + $0x110] ss:$8 sps:$4 sm:$0xff]   ;;  %v1035_v26 = vld [vmem:[%s1552_s0 + $0x44] ss:$8 sps:$4 sm:$0xff]   ;;  %v1037_v28 = vld [vmem:[%s1552_s0 + $0x40] ss:$8 sps:$4 sm:$0xff]  }
   0xa   :  { %485 = vmatpush1.bf16.msra.mxu0 %v1004_v3  ;;  %994 = vmatpush1.bf16.msra.mxu1 %v1004_v3  ;;  %v1038_v27 = vld [vmem:[%s1552_s0 + $0x124] ss:$8 sps:$4 sm:$0xff]   ;;  %v1040_v29 = vld [vmem:[%s1552_s0 + $0x120] ss:$8 sps:$4 sm:$0xff]   ;;  %v1041_v30 = vld [vmem:[%s1552_s0 + $0x54] ss:$8 sps:$4 sm:$0xff]  }
   0xb   :  { %486 = vmatprep.subr.bf16.mxu0 %v1095_v0  ;;  %986 = vmatprep.subr.bf16.mxu1 %v1095_v0  ;;  %v1044_v31 = vld [vmem:[%s1552_s0 + $0x134] ss:$8 sps:$4 sm:$0xff]   ;;  %v1043_v32 = vld [vmem:[%s1552_s0 + $0x50] ss:$8 sps:$4 sm:$0xff]   ;;  %v1047_v34 = vld [vmem:[%s1552_s0 + $0x64] ss:$8 sps:$4 sm:$0xff]  }
   0xc   :  { %v1046_v33 = vld [vmem:[%s1552_s0 + $0x130] ss:$8 sps:$4 sm:$0xff]   ;;  %v1050_v35 = vld [vmem:[%s1552_s0 + $0x144] ss:$8 sps:$4 sm:$0xff]   ;;  %v1049_v36 = vld [vmem:[%s1552_s0 + $0x60] ss:$8 sps:$4 sm:$0xff]  }
   0xd   :  { %v1052_v37 = vld [vmem:[%s1552_s0 + $0x140] ss:$8 sps:$4 sm:$0xff]   ;;  %v1053_v38 = vld [vmem:[%s1552_s0 + $0x74] ss:$8 sps:$4 sm:$0xff]   ;;  %v1055_v40 = vld [vmem:[%s1552_s0 + $0x70] ss:$8 sps:$4 sm:$0xff]  }
   0xe   :  { %487 = vmatpush1.bf16.msra.mxu0 %v1005_v4  ;;  %995 = vmatpush1.bf16.msra.mxu1 %v1005_v4  ;;  %v1056_v39 = vld [vmem:[%s1552_s0 + $0x154] ss:$8 sps:$4 sm:$0xff]   ;;  %v1058_v41 = vld [vmem:[%s1552_s0 + $0x150] ss:$8 sps:$4 sm:$0xff]   ;;  %v1059_v42 = vld [vmem:[%s1552_s0 + $0x84] ss:$8 sps:$4 sm:$0xff]  }
   0xf   :  { %488 = vmatprep.subr.bf16.mxu0 %v1095_v0  ;;  %987 = vmatprep.subr.bf16.mxu1 %v1095_v0  ;;  %v1062_v43 = vld [vmem:[%s1552_s0 + $0x164] ss:$8 sps:$4 sm:$0xff]   ;;  %v1061_v44 = vld [vmem:[%s1552_s0 + $0x80] ss:$8 sps:$4 sm:$0xff]   ;;  %v1065_v46 = vld [vmem:[%s1552_s0 + $0x94] ss:$8 sps:$4 sm:$0xff]  }
  0x10   :  { %v1064_v45 = vld [vmem:[%s1552_s0 + $0x160] ss:$8 sps:$4 sm:$0xff]   ;;  %v1068_v47 = vld [vmem:[%s1552_s0 + $0x174] ss:$8 sps:$4 sm:$0xff]   ;;  %v1067_v48 = vld [vmem:[%s1552_s0 + $0x90] ss:$8 sps:$4 sm:$0xff]  }
  0x11   :  { %v1070_v49 = vld [vmem:[%s1552_s0 + $0x170] ss:$8 sps:$4 sm:$0xff]   ;;  %v1071_v50 = vld [vmem:[%s1552_s0 + $0xa4] ss:$8 sps:$4 sm:$0xff]   ;;  %v1073_v52 = vld [vmem:[%s1552_s0 + $0xa0] ss:$8 sps:$4 sm:$0xff]  }
  0x12   :  { %489 = vmatpush1.bf16.msra.mxu0 %v1006_v7  ;;  %996 = vmatpush1.bf16.msra.mxu1 %v1006_v7  ;;  %v1074_v51 = vld [vmem:[%s1552_s0 + $0x184] ss:$8 sps:$4 sm:$0xff]   ;;  %v1076_v53 = vld [vmem:[%s1552_s0 + $0x180] ss:$8 sps:$4 sm:$0xff]   ;;  %v1077_v54 = vld [vmem:[%s1552_s0 + $0xb4] ss:$8 sps:$4 sm:$0xff]  }
  0x13   :  { %490 = vmatprep.subr.bf16.mxu0 %v1095_v0  ;;  %988 = vmatprep.subr.bf16.mxu1 %v1095_v0  ;;  %v1080_v55 = vld [vmem:[%s1552_s0 + $0x194] ss:$8 sps:$4 sm:$0xff]   ;;  %v1079_v56 = vld [vmem:[%s1552_s0 + $0xb0] ss:$8 sps:$4 sm:$0xff]   ;;  %v1083_v58 = vld [vmem:[%s1552_s0 + $0xc4] ss:$8 sps:$4 sm:$0xff]  }
  0x14   :  { %v1082_v57 = vld [vmem:[%s1552_s0 + $0x190] ss:$8 sps:$4 sm:$0xff]   ;;  %v1086_v59 = vld [vmem:[%s1552_s0 + $0x1a4] ss:$8 sps:$4 sm:$0xff]   ;;  %v1085_v60 = vld [vmem:[%s1552_s0 + $0xc0] ss:$8 sps:$4 sm:$0xff]  }
  0x15   :  { %v1088_v61 = vld [vmem:[%s1552_s0 + $0x1a0] ss:$8 sps:$4 sm:$0xff]   ;;  %v1089_v62 = vld [vmem:[%s1552_s0 + $0xd4] ss:$8 sps:$4 sm:$0xff]   ;;  %v1094_v1 = vld [vmem:[%s1552_s0 + $0x1b0] ss:$8 sps:$4 sm:$0xff]  }
  0x16   :  { %491 = vmatpush1.bf16.msra.mxu0 %v1007_v8  ;;  %997 = vmatpush1.bf16.msra.mxu1 %v1007_v8  ;;  %v1092_v63 = vld [vmem:[%s1552_s0 + $0x1b4] ss:$8 sps:$4 sm:$0xff]  }
  0x17   :  { %492 = vmatprep.subr.bf16.mxu0 %v1095_v0  ;;  %989 = vmatprep.subr.bf16.mxu1 %v1095_v0 }
  0x1a   :  { %493 = vmatpush1.bf16.msra.mxu0 %v1008_v9  ;;  %998 = vmatpush1.bf16.msra.mxu1 %v1008_v9 }
  0x1b   :  { %494 = vmatprep.subr.bf16.mxu0 %v1095_v0  ;;  %990 = vmatprep.subr.bf16.mxu1 %v1095_v0 }
  0x1e   :  { %495 = vmatpush1.bf16.msra.mxu0 %v1009_v10  ;;  %999 = vmatpush1.bf16.msra.mxu1 %v1009_v10 }
  0x1f   :  { %496 = vmatprep.subr.bf16.mxu0 %v1095_v0  ;;  %991 = vmatprep.subr.bf16.mxu1 %v1095_v0  ;;  %v1091_v0 = vld [vmem:[%s1552_s0 + $0xd0] ss:$8 sps:$4 sm:$0xff]  }
  0x22   :  { %497 = vmatpush1.bf16.msra.mxu0 %v1010_v11  ;;  %1000 = vmatpush1.bf16.msra.mxu1 %v1010_v11 }
  0x25   :  { %513 = vmatmul.mubr.bf16.vlgmr.msra.gmra.mrb[0].mxu0 %v1011_v12  ;;  %625 = vmatmul.mubr.bf16.vlgmr.msra.gmra.mrb[0].mxu1 %v1014_v13 }
  0x26   :  { %955 = vmatprep.mubr.msk.bf16.mxu0 %vm395_vm0, %v1017_v14  ;;  %969 = vmatprep.mubr.msk.bf16.mxu1 %vm395_vm0, %v1020_v15 }
  0x2d   :  { %521 = vmatmul.mubr.bf16.gmra.mrb[4].mxu0 %v1019_v16  ;;  %633 = vmatmul.mubr.bf16.gmra.mrb[4].mxu1 %v1022_v17 }
  0x2e   :  { %956 = vmatprep.mubr.msk.bf16.mxu0 %vm395_vm0, %v1023_v18  ;;  %970 = vmatprep.mubr.msk.bf16.mxu1 %vm395_vm0, %v1026_v19 }
  0x35   :  { %529 = vmatmul.mubr.bf16.gmra.mrb[8].mxu0 %v1025_v20  ;;  %641 = vmatmul.mubr.bf16.gmra.mrb[8].mxu1 %v1028_v21 }
  0x36   :  { %957 = vmatprep.mubr.msk.bf16.mxu0 %vm395_vm0, %v1029_v22  ;;  %971 = vmatprep.mubr.msk.bf16.mxu1 %vm395_vm0, %v1032_v23 }
  0x3d   :  { %537 = vmatmul.mubr.bf16.gmra.mrb[12].mxu0 %v1031_v24  ;;  %649 = vmatmul.mubr.bf16.gmra.mrb[12].mxu1 %v1034_v25 }
  0x3e   :  { %958 = vmatprep.mubr.msk.bf16.mxu0 %vm395_vm0, %v1035_v26  ;;  %972 = vmatprep.mubr.msk.bf16.mxu1 %vm395_vm0, %v1038_v27 }
  0x45   :  { %545 = vmatmul.mubr.bf16.gmra.mrb[16].mxu0 %v1037_v28  ;;  %657 = vmatmul.mubr.bf16.gmra.mrb[16].mxu1 %v1040_v29 }
  0x46   :  { %959 = vmatprep.mubr.msk.bf16.mxu0 %vm395_vm0, %v1041_v30  ;;  %973 = vmatprep.mubr.msk.bf16.mxu1 %vm395_vm0, %v1044_v31 }
  0x4d   :  { %553 = vmatmul.mubr.bf16.gmra.mrb[20].mxu0 %v1043_v32  ;;  %665 = vmatmul.mubr.bf16.gmra.mrb[20].mxu1 %v1046_v33 }
  0x4e   :  { %960 = vmatprep.mubr.msk.bf16.mxu0 %vm395_vm0, %v1047_v34  ;;  %974 = vmatprep.mubr.msk.bf16.mxu1 %vm395_vm0, %v1050_v35 }
  0x55   :  { %561 = vmatmul.mubr.bf16.gmra.mrb[24].mxu0 %v1049_v36  ;;  %673 = vmatmul.mubr.bf16.gmra.mrb[24].mxu1 %v1052_v37 }
  0x56   :  { %961 = vmatprep.mubr.msk.bf16.mxu0 %vm395_vm0, %v1053_v38  ;;  %975 = vmatprep.mubr.msk.bf16.mxu1 %vm395_vm0, %v1056_v39 }
  0x5d   :  { %569 = vmatmul.mubr.bf16.gmra.mrb[28].mxu0 %v1055_v40  ;;  %681 = vmatmul.mubr.bf16.gmra.mrb[28].mxu1 %v1058_v41 }
  0x5e   :  { %962 = vmatprep.mubr.msk.bf16.mxu0 %vm395_vm0, %v1059_v42  ;;  %976 = vmatprep.mubr.msk.bf16.mxu1 %vm395_vm0, %v1062_v43 }
  0x65   :  { %577 = vmatmul.mubr.bf16.gmra.mrb[32].mxu0 %v1061_v44  ;;  %689 = vmatmul.mubr.bf16.gmra.mrb[32].mxu1 %v1064_v45 }
  0x66   :  { %963 = vmatprep.mubr.msk.bf16.mxu0 %vm395_vm0, %v1065_v46  ;;  %977 = vmatprep.mubr.msk.bf16.mxu1 %vm395_vm0, %v1068_v47 }
  0x6d   :  { %585 = vmatmul.mubr.bf16.gmra.mrb[36].mxu0 %v1067_v48  ;;  %697 = vmatmul.mubr.bf16.gmra.mrb[36].mxu1 %v1070_v49 }
  0x6e   :  { %964 = vmatprep.mubr.msk.bf16.mxu0 %vm395_vm0, %v1071_v50  ;;  %978 = vmatprep.mubr.msk.bf16.mxu1 %vm395_vm0, %v1074_v51 }
  0x75   :  { %593 = vmatmul.mubr.bf16.gmra.mrb[40].mxu0 %v1073_v52  ;;  %705 = vmatmul.mubr.bf16.gmra.mrb[40].mxu1 %v1076_v53 }
  0x76   :  { %965 = vmatprep.mubr.msk.bf16.mxu0 %vm395_vm0, %v1077_v54  ;;  %979 = vmatprep.mubr.msk.bf16.mxu1 %vm395_vm0, %v1080_v55 }
  0x7d   :  { %601 = vmatmul.mubr.bf16.gmra.mrb[44].mxu0 %v1079_v56  ;;  %713 = vmatmul.mubr.bf16.gmra.mrb[44].mxu1 %v1082_v57 }
  0x7e   :  { %966 = vmatprep.mubr.msk.bf16.mxu0 %vm395_vm0, %v1083_v58  ;;  %980 = vmatprep.mubr.msk.bf16.mxu1 %vm395_vm0, %v1086_v59 }
  0x85   :  { %609 = vmatmul.mubr.bf16.gmra.mrb[48].mxu0 %v1085_v60  ;;  %721 = vmatmul.mubr.bf16.gmra.mrb[48].mxu1 %v1088_v61 }
  0x86   :  { %967 = vmatprep.mubr.msk.bf16.mxu0 %vm395_vm0, %v1089_v62  ;;  %981 = vmatprep.mubr.msk.bf16.mxu1 %vm395_vm0, %v1092_v63 }
  0x8d   :  { %617 = vmatmul.mubr.bf16.gmra.mrb[52].mxu0 %v1091_v0  ;;  %729 = vmatmul.mubr.bf16.gmra.mrb[52].mxu1 %v1094_v1 }
  0xf8   :  { %v514_v2 = vpop.f32.mrb[0].mxu0  ;;  %v1339_v3 = vpop.f32.mrb[0].mxu1 }
  0xf9   :  { %v516_v4 = vpop.f32.mrb[1].mxu0  ;;  %v628_v5 = vpop.f32.mrb[1].mxu1  ;;  %v738_v60 = vsel %vm737_vm1, %v514_v2, -inf }
  0xfa   :  { %v1341_v6 = vpop.f32.mrb[2].mxu0  ;;  %v1343_v7 = vpop.f32.mrb[2].mxu1  ;;  %v741_v5 = vsel %vm737_vm1, %v1339_v3, -inf }
  0xfb   :  { %v519_v8 = vpop.f32.mrb[3].mxu0  ;;  %v631_v9 = vpop.f32.mrb[3].mxu1 }
  0xfc   :  { %v745_v8 = vsel %vm737_vm1, %v1341_v6, -inf }
 0x100   :  { %v1345_v10 = vpop.f32.mrb[4].mxu0  ;;  %v1347_v11 = vpop.f32.mrb[4].mxu1 }
 0x101   :  { %v524_v12 = vpop.f32.mrb[5].mxu0  ;;  %v636_v13 = vpop.f32.mrb[5].mxu1 }
 0x102   :  { %v1349_v14 = vpop.f32.mrb[6].mxu0  ;;  %v1351_v15 = vpop.f32.mrb[6].mxu1 }
 0x103   :  { %v527_v16 = vpop.f32.mrb[7].mxu0  ;;  %v639_v17 = vpop.f32.mrb[7].mxu1 }
 0x108   :  { %v1353_v18 = vpop.f32.mrb[8].mxu0  ;;  %v1355_v19 = vpop.f32.mrb[8].mxu1 }
 0x109   :  { %v532_v20 = vpop.f32.mrb[9].mxu0  ;;  %v644_v21 = vpop.f32.mrb[9].mxu1 }
 0x10a   :  { %v1357_v22 = vpop.f32.mrb[10].mxu0  ;;  %v1359_v23 = vpop.f32.mrb[10].mxu1  ;;  %v748_v20 = vsel %vm737_vm1, %v1343_v7, -inf  ;;  %v1406_v21 = vld [vmem:[%s1553_s2] ss:$0 sm:$0xff] }
 0x10b   :  { %v535_v24 = vpop.f32.mrb[11].mxu0  ;;  %v647_v25 = vpop.f32.mrb[11].mxu1 }
 0x110   :  { %v1361_v26 = vpop.f32.mrb[12].mxu0  ;;  %v1363_v27 = vpop.f32.mrb[12].mxu1 }
 0x111   :  { %v540_v28 = vpop.f32.mrb[13].mxu0  ;;  %v652_v29 = vpop.f32.mrb[13].mxu1 }
 0x112   :  { %v1365_v30 = vpop.f32.mrb[14].mxu0  ;;  %v1367_v31 = vpop.f32.mrb[14].mxu1 }
 0x113   :  { %v543_v32 = vpop.f32.mrb[15].mxu0  ;;  %v655_v33 = vpop.f32.mrb[15].mxu1 }
 0x114   :  { %v752_v33 = vsel %vm737_vm1, %v1345_v10, -inf }
 0x118   :  { %v1369_v34 = vpop.f32.mrb[16].mxu0  ;;  %v1371_v35 = vpop.f32.mrb[16].mxu1 }
 0x119   :  { %v548_v36 = vpop.f32.mrb[17].mxu0  ;;  %v660_v37 = vpop.f32.mrb[17].mxu1 }
 0x11a   :  { %v1373_v38 = vpop.f32.mrb[18].mxu0  ;;  %v1375_v39 = vpop.f32.mrb[18].mxu1 }
 0x11b   :  { %v551_v40 = vpop.f32.mrb[19].mxu0  ;;  %v663_v41 = vpop.f32.mrb[19].mxu1 }
 0x120   :  { %v1377_v42 = vpop.f32.mrb[20].mxu0  ;;  %v1379_v43 = vpop.f32.mrb[20].mxu1 }
 0x121   :  { %v556_v44 = vpop.f32.mrb[21].mxu0  ;;  %v668_v45 = vpop.f32.mrb[21].mxu1 }
 0x122   :  { %v1381_v46 = vpop.f32.mrb[22].mxu0  ;;  %v1383_v47 = vpop.f32.mrb[22].mxu1 }
 0x123   :  { %v559_v48 = vpop.f32.mrb[23].mxu0  ;;  %v671_v49 = vpop.f32.mrb[23].mxu1 }
 0x124   :  { %v755_v49 = vsel %vm737_vm1, %v1347_v11, -inf  ;;  %v762_v11 = vsel %vm737_vm1, %v1351_v15, -inf }
 0x128   :  { %v1385_v50 = vpop.f32.mrb[24].mxu0  ;;  %v1387_v51 = vpop.f32.mrb[24].mxu1 }
 0x129   :  { %v564_v52 = vpop.f32.mrb[25].mxu0  ;;  %v676_v53 = vpop.f32.mrb[25].mxu1 }
 0x12a   :  { %v1389_v54 = vpop.f32.mrb[26].mxu0  ;;  %v1391_v55 = vpop.f32.mrb[26].mxu1  ;;  %v759_v52 = vsel %vm737_vm1, %v1349_v14, -inf }
 0x12b   :  { %v567_v56 = vpop.f32.mrb[27].mxu0  ;;  %v679_v57 = vpop.f32.mrb[27].mxu1 }
 0x130   :  { %v570_v58 = vpop.f32.mrb[28].mxu0  ;;  %v682_v59 = vpop.f32.mrb[28].mxu1 }
 0x131   :  { %v739_v61 = vsel %vm737_vm1, %v570_v58, -inf  ;;  %v572_v62 = vpop.f32.mrb[29].mxu0  ;;  %v684_v63 = vpop.f32.mrb[29].mxu1  ;;  %v743_v9 = vsel %vm737_vm1, %v682_v59, -inf }
 0x132   :  { %v740_v0 = vmax.f32 %v738_v60, %v739_v61  ;;  %v573_v1 = vpop.f32.mrb[30].mxu0  ;;  %v685_v4 = vpop.f32.mrb[30].mxu1 }
 0x133   :  { %v746_v12 = vsel %vm737_vm1, %v573_v1, -inf  ;;  %v575_v13 = vpop.f32.mrb[31].mxu0  ;;  %v687_v16 = vpop.f32.mrb[31].mxu1  ;;  %v750_v6 = vsel %vm737_vm1, %v685_v4, -inf }
 0x134   :  { %v742_v2 = vmax.f32 %v740_v0, %v741_v5  ;;  %v747_v17 = vmax.f32 %v745_v8, %v746_v12  ;;  %v766_v5 = vsel %vm737_vm1, %v1353_v18, -inf }
 0x136   :  { %v744_v3 = vmax.f32 %v742_v2, %v743_v9  ;;  %v749_v24 = vmax.f32 %v747_v17, %v748_v20  ;;  %v769_v20 = vsel %vm737_vm1, %v1355_v19, -inf  ;;  %v776_v19 = vsel %vm737_vm1, %v1359_v23, -inf }
 0x138   :  { %v843_v25 = vadd.f32 %v1406_v21, %v744_v3  ;;  %v751_v28 = vmax.f32 %v749_v24, %v750_v6  ;;  %v578_v29 = vpop.f32.mrb[32].mxu0  ;;  %v690_v32 = vpop.f32.mrb[32].mxu1  ;;  %v773_v3 = vsel %vm737_vm1, %v1357_v22, -inf }
 0x139   :  { %v753_v36 = vsel %vm737_vm1, %v578_v29, -inf  ;;  %v580_v7 = vpop.f32.mrb[33].mxu0  ;;  %v692_v37 = vpop.f32.mrb[33].mxu1  ;;  %v757_v53 = vsel %vm737_vm1, %v690_v32, -inf }
 0x13a   :  { %v857_v40 = vmax.f32 %v843_v25, 0.0  ;;  %v844_v41 = vadd.f32 %v1406_v21, %v751_v28  ;;  %v754_v44 = vmax.f32 %v752_v33, %v753_v36  ;;  %v581_v45 = vpop.f32.mrb[34].mxu0  ;;  %v693_v48 = vpop.f32.mrb[34].mxu1 }
 0x13b   :  { %v760_v10 = vsel %vm737_vm1, %v581_v45, -inf  ;;  %v583_v56 = vpop.f32.mrb[35].mxu0  ;;  %v695_v57 = vpop.f32.mrb[35].mxu1  ;;  %v764_v62 = vsel %vm737_vm1, %v693_v48, -inf }
 0x13c   :  { %871 = vst.msk [vmem:[%s1554_s3] sm:$0xff] %vm737_vm1, %v857_v40  ;;  %v858_v58 = vmax.f32 %v844_v41, 0.0  ;;  %v756_v59 = vmax.f32 %v754_v44, %v755_v49  ;;  %v761_v60 = vmax.f32 %v759_v52, %v760_v10  ;;  %v780_v44 = vsel %vm737_vm1, %v1361_v26, -inf }
 0x13d   :  { %v783_v57 = vsel %vm737_vm1, %v1363_v27, -inf  ;;  %v790_v27 = vsel %vm737_vm1, %v1367_v31, -inf }
 0x13e   :  { %872 = vst.msk [vmem:[%s1554_s3 + $0x8] sm:$0xff] %vm737_vm1, %v858_v58  ;;  %v758_v14 = vmax.f32 %v756_v59, %v757_v53  ;;  %v763_v61 = vmax.f32 %v761_v60, %v762_v11  ;;  %v787_v58 = vsel %vm737_vm1, %v1365_v30, -inf }
 0x140   :  { %v845_v63 = vadd.f32 %v1406_v21, %v758_v14  ;;  %v765_v0 = vmax.f32 %v763_v61, %v764_v62  ;;  %v586_v1 = vpop.f32.mrb[36].mxu0  ;;  %v698_v4 = vpop.f32.mrb[36].mxu1 }
 0x141   :  { %v767_v8 = vsel %vm737_vm1, %v586_v1, -inf  ;;  %v588_v15 = vpop.f32.mrb[37].mxu0  ;;  %v700_v9 = vpop.f32.mrb[37].mxu1  ;;  %v771_v24 = vsel %vm737_vm1, %v698_v4, -inf }
 0x142   :  { %v859_v12 = vmax.f32 %v845_v63, 0.0  ;;  %v846_v13 = vadd.f32 %v1406_v21, %v765_v0  ;;  %v768_v16 = vmax.f32 %v766_v5, %v767_v8  ;;  %v589_v2 = vpop.f32.mrb[38].mxu0  ;;  %v701_v17 = vpop.f32.mrb[38].mxu1  ;;  %v794_v15 = vsel %vm737_vm1, %v1369_v34, -inf }
 0x143   :  { %v774_v18 = vsel %vm737_vm1, %v589_v2, -inf  ;;  %v591_v6 = vpop.f32.mrb[39].mxu0  ;;  %v703_v25 = vpop.f32.mrb[39].mxu1  ;;  %v778_v36 = vsel %vm737_vm1, %v701_v17, -inf }
 0x144   :  { %873 = vst.msk [vmem:[%s1554_s3 + $0x10] sm:$0xff] %vm737_vm1, %v859_v12  ;;  %v860_v28 = vmax.f32 %v846_v13, 0.0  ;;  %v770_v29 = vmax.f32 %v768_v16, %v769_v20  ;;  %v775_v32 = vmax.f32 %v773_v3, %v774_v18  ;;  %v797_v3 = vsel %vm737_vm1, %v1371_v35, -inf }
 0x145   :  { %v804_v35 = vsel %vm737_vm1, %v1375_v39, -inf }
 0x146   :  { %874 = vst.msk [vmem:[%s1554_s3 + $0x18] sm:$0xff] %vm737_vm1, %v860_v28  ;;  %v772_v22 = vmax.f32 %v770_v29, %v771_v24  ;;  %v777_v33 = vmax.f32 %v775_v32, %v776_v19  ;;  %v801_v24 = vsel %vm737_vm1, %v1373_v38, -inf }
 0x148   :  { %v847_v7 = vadd.f32 %v1406_v21, %v772_v22  ;;  %v779_v37 = vmax.f32 %v777_v33, %v778_v36  ;;  %v594_v40 = vpop.f32.mrb[40].mxu0  ;;  %v706_v41 = vpop.f32.mrb[40].mxu1 }
 0x149   :  { %v781_v45 = vsel %vm737_vm1, %v594_v40, -inf  ;;  %v596_v23 = vpop.f32.mrb[41].mxu0  ;;  %v708_v48 = vpop.f32.mrb[41].mxu1  ;;  %v785_v59 = vsel %vm737_vm1, %v706_v41, -inf  ;;  %v808_v40 = vsel %vm737_vm1, %v1377_v42, -inf }
 0x14a   :  { %v861_v49 = vmax.f32 %v847_v7, 0.0  ;;  %v848_v52 = vadd.f32 %v1406_v21, %v779_v37  ;;  %v782_v53 = vmax.f32 %v780_v44, %v781_v45  ;;  %v597_v10 = vpop.f32.mrb[42].mxu0  ;;  %v709_v56 = vpop.f32.mrb[42].mxu1 }
 0x14b   :  { %v788_v26 = vsel %vm737_vm1, %v597_v10, -inf  ;;  %v599_v60 = vpop.f32.mrb[43].mxu0  ;;  %v711_v11 = vpop.f32.mrb[43].mxu1  ;;  %v792_v0 = vsel %vm737_vm1, %v709_v56, -inf  ;;  %v815_v10 = vsel %vm737_vm1, %v1381_v46, -inf }
 0x14c   :  { %875 = vst.msk [vmem:[%s1554_s3 + $0x20] sm:$0xff] %vm737_vm1, %v861_v49  ;;  %v862_v14 = vmax.f32 %v848_v52, 0.0  ;;  %v784_v61 = vmax.f32 %v782_v53, %v783_v57  ;;  %v789_v62 = vmax.f32 %v787_v58, %v788_v26  ;;  %v811_v53 = vsel %vm737_vm1, %v1379_v43, -inf }
 0x14d   :  { %v818_v43 = vsel %vm737_vm1, %v1383_v47, -inf }
 0x14e   :  { %876 = vst.msk [vmem:[%s1554_s3 + $0x28] sm:$0xff] %vm737_vm1, %v862_v14  ;;  %v786_v30 = vmax.f32 %v784_v61, %v785_v59  ;;  %v791_v63 = vmax.f32 %v789_v62, %v790_v27 }
 0x150   :  { %v849_v1 = vadd.f32 %v1406_v21, %v786_v30  ;;  %v793_v4 = vmax.f32 %v791_v63, %v792_v0  ;;  %v602_v5 = vpop.f32.mrb[44].mxu0  ;;  %v714_v8 = vpop.f32.mrb[44].mxu1  ;;  %v822_v63 = vsel %vm737_vm1, %v1385_v50, -inf }
 0x151   :  { %v795_v9 = vsel %vm737_vm1, %v602_v5, -inf  ;;  %v604_v31 = vpop.f32.mrb[45].mxu0  ;;  %v716_v12 = vpop.f32.mrb[45].mxu1  ;;  %v799_v18 = vsel %vm737_vm1, %v714_v8, -inf }
 0x152   :  { %v863_v13 = vmax.f32 %v849_v1, 0.0  ;;  %v850_v16 = vadd.f32 %v1406_v21, %v793_v4  ;;  %v796_v2 = vmax.f32 %v794_v15, %v795_v9  ;;  %v605_v17 = vpop.f32.mrb[46].mxu0  ;;  %v717_v20 = vpop.f32.mrb[46].mxu1  ;;  %v825_v31 = vsel %vm737_vm1, %v1387_v51, -inf }
 0x153   :  { %v802_v34 = vsel %vm737_vm1, %v605_v17, -inf  ;;  %v607_v6 = vpop.f32.mrb[47].mxu0  ;;  %v719_v25 = vpop.f32.mrb[47].mxu1  ;;  %v806_v22 = vsel %vm737_vm1, %v717_v20, -inf  ;;  %v829_v12 = vsel %vm737_vm1, %v1389_v54, -inf  ;;  %v832_v51 = vsel %vm737_vm1, %v1391_v55, -inf }
 0x154   :  { %877 = vst.msk [vmem:[%s1554_s3 + $0x30] sm:$0xff] %vm737_vm1, %v863_v13  ;;  %v864_v28 = vmax.f32 %v850_v16, 0.0  ;;  %v798_v29 = vmax.f32 %v796_v2, %v797_v3  ;;  %v803_v32 = vmax.f32 %v801_v24, %v802_v34 }
 0x156   :  { %878 = vst.msk [vmem:[%s1554_s3 + $0x38] sm:$0xff] %vm737_vm1, %v864_v28  ;;  %v800_v38 = vmax.f32 %v798_v29, %v799_v18  ;;  %v805_v19 = vmax.f32 %v803_v32, %v804_v35 }
 0x158   :  { %v851_v33 = vadd.f32 %v1406_v21, %v800_v38  ;;  %v807_v36 = vmax.f32 %v805_v19, %v806_v22  ;;  %v610_v7 = vpop.f32.mrb[48].mxu0  ;;  %v722_v37 = vpop.f32.mrb[48].mxu1 }
 0x159   :  { %v809_v41 = vsel %vm737_vm1, %v610_v7, -inf  ;;  %v612_v39 = vpop.f32.mrb[49].mxu0  ;;  %v724_v44 = vpop.f32.mrb[49].mxu1  ;;  %v813_v56 = vsel %vm737_vm1, %v722_v37, -inf }
 0x15a   :  { %v865_v45 = vmax.f32 %v851_v33, 0.0  ;;  %v852_v23 = vadd.f32 %v1406_v21, %v807_v36  ;;  %v810_v48 = vmax.f32 %v808_v40, %v809_v41  ;;  %v613_v49 = vpop.f32.mrb[50].mxu0  ;;  %v725_v52 = vpop.f32.mrb[50].mxu1 }
 0x15b   :  { %v816_v42 = vsel %vm737_vm1, %v613_v49, -inf  ;;  %v615_v57 = vpop.f32.mrb[51].mxu0  ;;  %v727_v58 = vpop.f32.mrb[51].mxu1  ;;  %v820_v14 = vsel %vm737_vm1, %v725_v52, -inf }
 0x15c   :  { %879 = vst.msk [vmem:[%s1554_s3 + $0x40] sm:$0xff] %vm737_vm1, %v865_v45  ;;  %v866_v59 = vmax.f32 %v852_v23, 0.0  ;;  %v812_v26 = vmax.f32 %v810_v48, %v811_v53  ;;  %v817_v60 = vmax.f32 %v815_v10, %v816_v42 }
 0x15e   :  { %880 = vst.msk [vmem:[%s1554_s3 + $0x48] sm:$0xff] %vm737_vm1, %v866_v59  ;;  %v814_v46 = vmax.f32 %v812_v26, %v813_v56  ;;  %v819_v11 = vmax.f32 %v817_v60, %v818_v43 }
 0x160   :  { %v853_v61 = vadd.f32 %v1406_v21, %v814_v46  ;;  %v821_v62 = vmax.f32 %v819_v11, %v820_v14  ;;  %v618_v27 = vpop.f32.mrb[52].mxu0  ;;  %v730_v30 = vpop.f32.mrb[52].mxu1 }
 0x161   :  { %v823_v0 = vsel %vm737_vm1, %v618_v27, -inf  ;;  %v620_v47 = vpop.f32.mrb[53].mxu0  ;;  %v732_v1 = vpop.f32.mrb[53].mxu1  ;;  %v827_v13 = vsel %vm737_vm1, %v730_v30, -inf }
 0x162   :  { %v867_v4 = vmax.f32 %v853_v61, 0.0  ;;  %v854_v5 = vadd.f32 %v1406_v21, %v821_v62  ;;  %v824_v8 = vmax.f32 %v822_v63, %v823_v0  ;;  %v621_v15 = vpop.f32.mrb[54].mxu0  ;;  %v733_v9 = vpop.f32.mrb[54].mxu1 }
 0x163   :  { %v830_v50 = vsel %vm737_vm1, %v621_v15, -inf  ;;  %v623_v16 = vpop.f32.mrb[55].mxu0  ;;  %v735_v2 = vpop.f32.mrb[55].mxu1  ;;  %v834_v18 = vsel %vm737_vm1, %v733_v9, -inf }
 0x164   :  { %881 = vst.msk [vmem:[%s1554_s3 + $0x50] sm:$0xff] %vm737_vm1, %v867_v4  ;;  %v868_v17 = vmax.f32 %v854_v5, 0.0  ;;  %v826_v20 = vmax.f32 %v824_v8, %v825_v31  ;;  %v831_v3 = vmax.f32 %v829_v12, %v830_v50 }
 0x166   :  { %882 = vst.msk [vmem:[%s1554_s3 + $0x58] sm:$0xff] %vm737_vm1, %v868_v17  ;;  %v828_v54 = vmax.f32 %v826_v20, %v827_v13  ;;  %v833_v24 = vmax.f32 %v831_v3, %v832_v51 }
 0x168   :  { %v855_v34 = vadd.f32 %v1406_v21, %v828_v54  ;;  %v835_v6 = vmax.f32 %v833_v24, %v834_v18 }
 0x16a   :  { %v869_v25 = vmax.f32 %v855_v34, 0.0  ;;  %v856_v28 = vadd.f32 %v1406_v21, %v835_v6 }
 0x16c   :  { %883 = vst.msk [vmem:[%s1554_s3 + $0x60] sm:$0xff] %vm737_vm1, %v869_v25  ;;  %v870_v55 = vmax.f32 %v856_v28, 0.0 }
 0x16e   :  { %884 = vst.msk [vmem:[%s1554_s3 + $0x68] sm:$0xff] %vm737_vm1, %v870_v55 }

// kernel: char_cnn_forward.5
= control target key start
LH: loop header
LB: loop body
LE: loop exit
PB: predicated region body
PF: predicated region fallthrough
CT: control target
= control target key end

     0   :  { %vm1726_vm0 = vmmov 0   ;;  %vm891_vm1 = vcmask 261120   ;;  %vm1297_vm2 = vcmask 15360   ;;  %s2126_s1 = inlined_call_operand.vmem [shape: bf16[1568,128], index: 1, kind: input, shape index: {}]   ;;  %s2127_s0 = inlined_call_operand.vmem [shape: bf16[16,1568], index: 0, kind: input, shape index: {}]   ;;  %s2128_s3 = inlined_call_operand.vmem [shape: bf16[128,2], index: 3, kind: input, shape index: {}]   ;;  %s2129_s2 = inlined_call_operand.vmem [shape: f32[1,128], index: 2, kind: input, shape index: {}]   ;;  %s2130_s4 = inlined_call_operand.vmem [shape: f32[1,2], index: 4, kind: input, shape index: {}]   ;;  %s2131_s5 = inlined_call_operand.vmem [shape: f32[16,2], index: 5, kind: output, shape index: {}]  }
   0x1   :  { %v1600_v0 = vld [vmem:[%s2126_s1 + $0x40] sm:$0xff]   ;;  %v1604_v4 = vld [vmem:[%s2126_s1 + $0x48] sm:$0xff]   ;;  %v1608_v8 = vld [vmem:[%s2126_s1 + $0x50] sm:$0xff]  }
   0x2   :  { %v1601_v1 = vld [vmem:[%s2126_s1] sm:$0xff]   ;;  %1426 = vmatprep.subr.bf16.mxu0 %v1600_v0  ;;  %v1605_v5 = vld [vmem:[%s2126_s1 + $0x8] sm:$0xff]   ;;  %v1609_v9 = vld [vmem:[%s2126_s1 + $0x10] sm:$0xff]  }
   0x3   :  { %v1602_v2 = vld [vmem:[%s2126_s1 + $0xc0] sm:$0xff]   ;;  %1427 = vmatpush3.bf16.msra.mxu0 %v1601_v1  ;;  %v1606_v6 = vld [vmem:[%s2126_s1 + $0xc8] sm:$0xff]   ;;  %v1610_v10 = vld [vmem:[%s2126_s1 + $0xd0] sm:$0xff]  }
   0x4   :  { %v1603_v3 = vld [vmem:[%s2126_s1 + $0x80] sm:$0xff]   ;;  %1448 = vmatprep.subr.bf16.mxu1 %v1602_v2  ;;  %1428 = vmatprep.subr.bf16.mxu0 %v1604_v4  ;;  %v1607_v7 = vld [vmem:[%s2126_s1 + $0x88] sm:$0xff]   ;;  %v1611_v11 = vld [vmem:[%s2126_s1 + $0x90] sm:$0xff]  }
   0x5   :  { %1449 = vmatpush3.bf16.msra.mxu1 %v1603_v3  ;;  %v1612_v12 = vld [vmem:[%s2126_s1 + $0x58] sm:$0xff]   ;;  %v1616_v16 = vld [vmem:[%s2126_s1 + $0x60] sm:$0xff]   ;;  %v1620_v20 = vld [vmem:[%s2126_s1 + $0x68] sm:$0xff]  }
   0x6   :  { %1450 = vmatprep.subr.bf16.mxu1 %v1606_v6  ;;  %v1613_v13 = vld [vmem:[%s2126_s1 + $0x18] sm:$0xff]   ;;  %v1617_v17 = vld [vmem:[%s2126_s1 + $0x20] sm:$0xff]   ;;  %v1621_v21 = vld [vmem:[%s2126_s1 + $0x28] sm:$0xff]  }
   0x7   :  { %1429 = vmatpush3.bf16.msra.mxu0 %v1605_v5  ;;  %v1614_v14 = vld [vmem:[%s2126_s1 + $0xd8] sm:$0xff]   ;;  %v1618_v18 = vld [vmem:[%s2126_s1 + $0xe0] sm:$0xff]   ;;  %v1622_v22 = vld [vmem:[%s2126_s1 + $0xe8] sm:$0xff]  }
   0x8   :  { %1430 = vmatprep.subr.bf16.mxu0 %v1608_v8  ;;  %v1615_v15 = vld [vmem:[%s2126_s1 + $0x98] sm:$0xff]   ;;  %v1619_v19 = vld [vmem:[%s2126_s1 + $0xa0] sm:$0xff]   ;;  %v1623_v23 = vld [vmem:[%s2126_s1 + $0xa8] sm:$0xff]  }
   0x9   :  { %1451 = vmatpush3.bf16.msra.mxu1 %v1607_v7  ;;  %v1624_v24 = vld [vmem:[%s2126_s1 + $0x70] sm:$0xff]   ;;  %v1628_v28 = vld [vmem:[%s2126_s1 + $0x78] sm:$0xff]   ;;  %v1635_v34 = vld [vmem:[%s2126_s1 + $0x140] sm:$0xff]  }
   0xa   :  { %1452 = vmatprep.subr.bf16.mxu1 %v1610_v10  ;;  %v1625_v25 = vld [vmem:[%s2126_s1 + $0x30] sm:$0xff]   ;;  %v1629_v29 = vld [vmem:[%s2126_s1 + $0x38] sm:$0xff]   ;;  %v1638_v36 = vld [vmem:[%s2127_s0 + $0xc] ss:$52 sps:$4 sm:$0xff]  }
   0xb   :  { %1431 = vmatpush3.bf16.msra.mxu0 %v1609_v9  ;;  %v1626_v26 = vld [vmem:[%s2126_s1 + $0xf0] sm:$0xff]   ;;  %v1630_v30 = vld [vmem:[%s2126_s1 + $0xf8] sm:$0xff]   ;;  %v1639_v37 = vld [vmem:[%s2126_s1 + $0x100] sm:$0xff]   ;;  %968 = vmatprep.mubr.bf16.mxu1 %v1638_v36 }
   0xc   :  { %1432 = vmatprep.subr.bf16.mxu0 %v1612_v12  ;;  %v1627_v27 = vld [vmem:[%s2126_s1 + $0xb0] sm:$0xff]   ;;  %v1631_v31 = vld [vmem:[%s2126_s1 + $0xb8] sm:$0xff]   ;;  %v1640_v38 = vld [vmem:[%s2126_s1 + $0x1c0] sm:$0xff]  }
   0xd   :  { %1453 = vmatpush3.bf16.msra.mxu1 %v1611_v11  ;;  %v1632_v32 = vld [vmem:[%s2127_s0] ss:$52 sps:$4 sm:$0xff]   ;;  %v1634_v33 = vld [vmem:[%s2127_s0 + $0x4] ss:$52 sps:$4 sm:$0xff]   ;;  %v1636_v35 = vld [vmem:[%s2127_s0 + $0x8] ss:$52 sps:$4 sm:$0xff]  }
   0xe   :  { %1454 = vmatprep.subr.bf16.mxu1 %v1614_v14  ;;  %927 = vmatprep.mubr.bf16.mxu0 %v1634_v33  ;;  %v1641_v39 = vld [vmem:[%s2126_s1 + $0x180] sm:$0xff]   ;;  %v1642_v40 = vld [vmem:[%s2126_s1 + $0x148] sm:$0xff]   ;;  %v1646_v44 = vld [vmem:[%s2126_s1 + $0x150] sm:$0xff]  }
   0xf   :  { %1433 = vmatpush3.bf16.msra.mxu0 %v1613_v13  ;;  %v1643_v41 = vld [vmem:[%s2126_s1 + $0x108] sm:$0xff]   ;;  %v1647_v45 = vld [vmem:[%s2126_s1 + $0x110] sm:$0xff]   ;;  %v1650_v48 = vld [vmem:[%s2126_s1 + $0x158] sm:$0xff]  }
  0x10   :  { %1434 = vmatprep.subr.bf16.mxu0 %v1616_v16  ;;  %v1644_v42 = vld [vmem:[%s2126_s1 + $0x1c8] sm:$0xff]   ;;  %v1648_v46 = vld [vmem:[%s2126_s1 + $0x1d0] sm:$0xff]   ;;  %v1651_v49 = vld [vmem:[%s2126_s1 + $0x118] sm:$0xff]  }
  0x11   :  { %1455 = vmatpush3.bf16.msra.mxu1 %v1615_v15  ;;  %v1645_v43 = vld [vmem:[%s2126_s1 + $0x188] sm:$0xff]   ;;  %v1649_v47 = vld [vmem:[%s2126_s1 + $0x190] sm:$0xff]   ;;  %v1652_v50 = vld [vmem:[%s2126_s1 + $0x1d8] sm:$0xff]  }
  0x12   :  { %1456 = vmatprep.subr.bf16.mxu1 %v1618_v18  ;;  %v1653_v51 = vld [vmem:[%s2126_s1 + $0x198] sm:$0xff]   ;;  %v1654_v52 = vld [vmem:[%s2126_s1 + $0x160] sm:$0xff]   ;;  %v1658_v56 = vld [vmem:[%s2126_s1 + $0x168] sm:$0xff]  }
  0x13   :  { %1435 = vmatpush3.bf16.msra.mxu0 %v1617_v17  ;;  %v1655_v53 = vld [vmem:[%s2126_s1 + $0x120] sm:$0xff]   ;;  %v1659_v57 = vld [vmem:[%s2126_s1 + $0x128] sm:$0xff]   ;;  %v1662_v60 = vld [vmem:[%s2126_s1 + $0x170] sm:$0xff]  }
  0x14   :  { %1436 = vmatprep.subr.bf16.mxu0 %v1620_v20  ;;  %v1656_v54 = vld [vmem:[%s2126_s1 + $0x1e0] sm:$0xff]   ;;  %v1660_v58 = vld [vmem:[%s2126_s1 + $0x1e8] sm:$0xff]   ;;  %v1663_v61 = vld [vmem:[%s2126_s1 + $0x130] sm:$0xff]  }
  0x15   :  { %1457 = vmatpush3.bf16.msra.mxu1 %v1619_v19  ;;  %v1657_v55 = vld [vmem:[%s2126_s1 + $0x1a0] sm:$0xff]   ;;  %v1661_v59 = vld [vmem:[%s2126_s1 + $0x1a8] sm:$0xff]   ;;  %v1664_v62 = vld [vmem:[%s2126_s1 + $0x1f0] sm:$0xff]  }
  0x16   :  { %1458 = vmatprep.subr.bf16.mxu1 %v1622_v22  ;;  %v1665_v63 = vld [vmem:[%s2126_s1 + $0x1b0] sm:$0xff]   ;;  %v1666_v0 = vld [vmem:[%s2126_s1 + $0x178] sm:$0xff]   ;;  %v1673_v6 = vld [vmem:[%s2126_s1 + $0x240] sm:$0xff]  }
  0x17   :  { %1437 = vmatpush3.bf16.msra.mxu0 %v1621_v21  ;;  %v1667_v1 = vld [vmem:[%s2126_s1 + $0x138] sm:$0xff]   ;;  %v1670_v4 = vld [vmem:[%s2127_s0 + $0x10] ss:$52 sps:$4 sm:$0xff]   ;;  %v1672_v5 = vld [vmem:[%s2127_s0 + $0x14] ss:$52 sps:$4 sm:$0xff]  }
  0x18   :  { %1438 = vmatprep.subr.bf16.mxu0 %v1624_v24  ;;  %v1668_v2 = vld [vmem:[%s2126_s1 + $0x1f8] sm:$0xff]   ;;  %v1677_v9 = vld [vmem:[%s2126_s1 + $0x200] sm:$0xff]   ;;  %v1680_v12 = vld [vmem:[%s2126_s1 + $0x248] sm:$0xff]  }
  0x19   :  { %1459 = vmatpush3.bf16.msra.mxu1 %v1623_v23  ;;  %v1669_v3 = vld [vmem:[%s2126_s1 + $0x1b8] sm:$0xff]   ;;  %v1678_v10 = vld [vmem:[%s2126_s1 + $0x2c0] sm:$0xff]   ;;  %v1681_v13 = vld [vmem:[%s2126_s1 + $0x208] sm:$0xff]  }
  0x1a   :  { %1460 = vmatprep.subr.bf16.mxu1 %v1626_v26  ;;  %v1674_v7 = vld [vmem:[%s2127_s0 + $0x18] ss:$52 sps:$4 sm:$0xff]   ;;  %v1676_v8 = vld [vmem:[%s2127_s0 + $0x1c] ss:$52 sps:$4 sm:$0xff]   ;;  %v1679_v11 = vld [vmem:[%s2126_s1 + $0x280] sm:$0xff]  }
  0x1b   :  { %1439 = vmatpush3.bf16.msra.mxu0 %v1625_v25  ;;  %v1682_v14 = vld [vmem:[%s2126_s1 + $0x2c8] sm:$0xff]   ;;  %v1684_v16 = vld [vmem:[%s2126_s1 + $0x250] sm:$0xff]   ;;  %v1688_v20 = vld [vmem:[%s2126_s1 + $0x258] sm:$0xff]  }
  0x1c   :  { %1440 = vmatprep.subr.bf16.mxu0 %v1628_v28  ;;  %v1683_v15 = vld [vmem:[%s2126_s1 + $0x288] sm:$0xff]   ;;  %v1685_v17 = vld [vmem:[%s2126_s1 + $0x210] sm:$0xff]   ;;  %v1689_v21 = vld [vmem:[%s2126_s1 + $0x218] sm:$0xff]  }
  0x1d   :  { %1461 = vmatpush3.bf16.msra.mxu1 %v1627_v27  ;;  %v1686_v18 = vld [vmem:[%s2126_s1 + $0x2d0] sm:$0xff]   ;;  %v1690_v22 = vld [vmem:[%s2126_s1 + $0x2d8] sm:$0xff]   ;;  %v1692_v24 = vld [vmem:[%s2126_s1 + $0x260] sm:$0xff]  }
  0x1e   :  { %1462 = vmatprep.subr.bf16.mxu1 %v1630_v30  ;;  %v1687_v19 = vld [vmem:[%s2126_s1 + $0x290] sm:$0xff]   ;;  %v1691_v23 = vld [vmem:[%s2126_s1 + $0x298] sm:$0xff]   ;;  %v1693_v25 = vld [vmem:[%s2126_s1 + $0x220] sm:$0xff]  }
  0x1f   :  { %1441 = vmatpush3.bf16.msra.mxu0 %v1629_v29  ;;  %v1694_v26 = vld [vmem:[%s2126_s1 + $0x2e0] sm:$0xff]   ;;  %v1696_v28 = vld [vmem:[%s2126_s1 + $0x268] sm:$0xff]   ;;  %v1701_v33 = vld [vmem:[%s2126_s1 + $0x230] sm:$0xff]  }
  0x20   :  { %1470 = vmatprep.subr.bf16.mxu0 %v1635_v34  ;;  %v1695_v27 = vld [vmem:[%s2126_s1 + $0x2a0] sm:$0xff]   ;;  %v1697_v29 = vld [vmem:[%s2126_s1 + $0x228] sm:$0xff]   ;;  %v1702_v34 = vld [vmem:[%s2126_s1 + $0x2f0] sm:$0xff]  }
  0x21   :  { %1463 = vmatpush3.bf16.msra.mxu1 %v1631_v31  ;;  %v1698_v30 = vld [vmem:[%s2126_s1 + $0x2e8] sm:$0xff]   ;;  %v1704_v36 = vld [vmem:[%s2126_s1 + $0x278] sm:$0xff]  }
  0x22   :  { %928 = vmatmul.mubr.bf16.vlgmr.msra.gmra.mrb[0].mxu0 %v1632_v32  ;;  %1492 = vmatprep.subr.bf16.mxu1 %v1640_v38  ;;  %v1699_v31 = vld [vmem:[%s2126_s1 + $0x2a8] sm:$0xff]   ;;  %v1700_v32 = vld [vmem:[%s2126_s1 + $0x270] sm:$0xff]   ;;  %v1706_v38 = vld [vmem:[%s2126_s1 + $0x2f8] sm:$0xff]  }
  0x23   :  { %1471 = vmatpush3.bf16.msra.mxu0 %v1639_v37  ;;  %1009 = vmatprep.mubr.bf16.mxu0 %v1672_v5  ;;  %v1705_v37 = vld [vmem:[%s2126_s1 + $0x238] sm:$0xff]  }
  0x24   :  { %969 = vmatmul.mubr.bf16.vlgmr.msra.gmra.mrb[0].mxu1 %v1636_v35  ;;  %1472 = vmatprep.subr.bf16.mxu0 %v1642_v40  ;;  %v1703_v35 = vld [vmem:[%s2126_s1 + $0x2b0] sm:$0xff]  }
  0x25   :  { %1493 = vmatpush3.bf16.msra.mxu1 %v1641_v39  ;;  %1050 = vmatprep.mubr.bf16.mxu1 %v1676_v8  ;;  %v1707_v39 = vld [vmem:[%s2126_s1 + $0x2b8] sm:$0xff]   ;;  %v1708_v40 = vld [vmem:[%s2127_s0 + $0x20] ss:$52 sps:$4 sm:$0xff]  }
  0x26   :  { %1494 = vmatprep.subr.bf16.mxu1 %v1644_v42  ;;  %v1725_v42 = vmov 0.0  }
  0x27   :  { %1473 = vmatpush3.bf16.msra.mxu0 %v1643_v41  ;;  %v1710_v41 = vld [vmem:[%s2127_s0 + $0x24] ss:$52 sps:$4 sm:$0xff]  }
  0x28   :  { %1474 = vmatprep.subr.bf16.mxu0 %v1646_v44  ;;  %v1713_v44 = vld [vmem:[%s2127_s0 + $0x2c] ss:$52 sps:$4 sm:$0xff]  }
  0x29   :  { %1495 = vmatpush3.bf16.msra.mxu1 %v1645_v43  ;;  %v1711_v43 = vld [vmem:[%s2127_s0 + $0x28] ss:$52 sps:$4 sm:$0xff]  }
  0x2a   :  { %1496 = vmatprep.subr.bf16.mxu1 %v1648_v46  ;;  %v1715_v46 = vld [vmem:[%s2126_s1 + $0x308] sm:$0xff]  }
  0x2b   :  { %1475 = vmatpush3.bf16.msra.mxu0 %v1647_v45  ;;  %v1714_v45 = vld [vmem:[%s2126_s1 + $0x300] sm:$0xff]  }
  0x2c   :  { %1476 = vmatprep.subr.bf16.mxu0 %v1650_v48  ;;  %v1717_v48 = vld [vmem:[%s2128_s3] sm:$0xff]  }
  0x2d   :  { %1497 = vmatpush3.bf16.msra.mxu1 %v1649_v47  ;;  %v1716_v47 = vld [vmem:[%s2127_s0 + $0x30] ss:$52 sps:$4 sm:$0xff]  }
  0x2e   :  { %1498 = vmatprep.subr.bf16.mxu1 %v1652_v50  ;;  %v1719_v50 = vld [vmem:[%s2128_s3 + $0x10] sm:$0xff]  }
  0x2f   :  { %1477 = vmatpush3.bf16.msra.mxu0 %v1651_v49  ;;  %v1718_v49 = vld [vmem:[%s2128_s3 + $0x8] sm:$0xff]  }
  0x30   :  { %1478 = vmatprep.subr.bf16.mxu0 %v1654_v52  ;;  %v1721_v52 = vld [vmem:[%s2128_s3 + $0x20] sm:$0xff]  }
  0x31   :  { %1499 = vmatpush3.bf16.msra.mxu1 %v1653_v51  ;;  %v1720_v51 = vld [vmem:[%s2128_s3 + $0x18] sm:$0xff]  }
  0x32   :  { %1500 = vmatprep.subr.bf16.mxu1 %v1656_v54  ;;  %v1723_v54 = vld [vmem:[%s2128_s3 + $0x30] sm:$0xff]  }
  0x33   :  { %1479 = vmatpush3.bf16.msra.mxu0 %v1655_v53  ;;  %v1722_v53 = vld [vmem:[%s2128_s3 + $0x28] sm:$0xff]  }
  0x34   :  { %1480 = vmatprep.subr.bf16.mxu0 %v1658_v56 }
  0x35   :  { %1501 = vmatpush3.bf16.msra.mxu1 %v1657_v55  ;;  %v1724_v55 = vld [vmem:[%s2128_s3 + $0x38] sm:$0xff]  }
  0x36   :  { %1502 = vmatprep.subr.bf16.mxu1 %v1660_v58 }
  0x37   :  { %1481 = vmatpush3.bf16.msra.mxu0 %v1659_v57  ;;  %v1304_v57 = vld [vmem:[%s2129_s2] ss:$0 sm:$0xff] }
  0x38   :  { %1482 = vmatprep.subr.bf16.mxu0 %v1662_v60 }
  0x39   :  { %1503 = vmatpush3.bf16.msra.mxu1 %v1661_v59 }
  0x3a   :  { %1504 = vmatprep.subr.bf16.mxu1 %v1664_v62 }
  0x3b   :  { %1483 = vmatpush3.bf16.msra.mxu0 %v1663_v61 }
  0x3c   :  { %1484 = vmatprep.subr.bf16.mxu0 %v1666_v0 }
  0x3d   :  { %1505 = vmatpush3.bf16.msra.mxu1 %v1665_v63 }
  0x3e   :  { %1506 = vmatprep.subr.bf16.mxu1 %v1668_v2 }
  0x3f   :  { %1485 = vmatpush3.bf16.msra.mxu0 %v1667_v1 }
  0x40   :  { %1514 = vmatprep.subr.bf16.mxu0 %v1673_v6 }
  0x41   :  { %1507 = vmatpush3.bf16.msra.mxu1 %v1669_v3 }
  0x42   :  { %1010 = vmatmul.mubr.bf16.vlgmr.msra.gmra.mrb[4].mxu0 %v1670_v4  ;;  %1536 = vmatprep.subr.bf16.mxu1 %v1678_v10 }
  0x43   :  { %1515 = vmatpush3.bf16.msra.mxu0 %v1677_v9  ;;  %1091 = vmatprep.mubr.bf16.mxu0 %v1710_v41 }
  0x44   :  { %1051 = vmatmul.mubr.bf16.vlgmr.msra.gmra.mrb[4].mxu1 %v1674_v7  ;;  %1516 = vmatprep.subr.bf16.mxu0 %v1680_v12 }
  0x45   :  { %1537 = vmatpush3.bf16.msra.mxu1 %v1679_v11  ;;  %1132 = vmatprep.mubr.bf16.mxu1 %v1713_v44 }
  0x46   :  { %1538 = vmatprep.subr.bf16.mxu1 %v1682_v14 }
  0x47   :  { %1517 = vmatpush3.bf16.msra.mxu0 %v1681_v13 }
  0x48   :  { %1518 = vmatprep.subr.bf16.mxu0 %v1684_v16 }
  0x49   :  { %1539 = vmatpush3.bf16.msra.mxu1 %v1683_v15 }
  0x4a   :  { %1540 = vmatprep.subr.bf16.mxu1 %v1686_v18 }
  0x4b   :  { %1519 = vmatpush3.bf16.msra.mxu0 %v1685_v17 }
  0x4c   :  { %1520 = vmatprep.subr.bf16.mxu0 %v1688_v20 }
  0x4d   :  { %1541 = vmatpush3.bf16.msra.mxu1 %v1687_v19 }
  0x4e   :  { %1542 = vmatprep.subr.bf16.mxu1 %v1690_v22 }
  0x4f   :  { %1521 = vmatpush3.bf16.msra.mxu0 %v1689_v21 }
  0x50   :  { %1522 = vmatprep.subr.bf16.mxu0 %v1692_v24 }
  0x51   :  { %1543 = vmatpush3.bf16.msra.mxu1 %v1691_v23 }
  0x52   :  { %1544 = vmatprep.subr.bf16.mxu1 %v1694_v26 }
  0x53   :  { %1523 = vmatpush3.bf16.msra.mxu0 %v1693_v25 }
  0x54   :  { %1524 = vmatprep.subr.bf16.mxu0 %v1696_v28 }
  0x55   :  { %1545 = vmatpush3.bf16.msra.mxu1 %v1695_v27 }
  0x56   :  { %1546 = vmatprep.subr.bf16.mxu1 %v1698_v30 }
  0x57   :  { %1525 = vmatpush3.bf16.msra.mxu0 %v1697_v29 }
  0x58   :  { %1526 = vmatprep.subr.bf16.mxu0 %v1700_v32 }
  0x59   :  { %1547 = vmatpush3.bf16.msra.mxu1 %v1699_v31 }
  0x5a   :  { %1548 = vmatprep.subr.bf16.mxu1 %v1702_v34 }
  0x5b   :  { %1527 = vmatpush3.bf16.msra.mxu0 %v1701_v33 }
  0x5c   :  { %1528 = vmatprep.subr.bf16.mxu0 %v1704_v36 }
  0x5d   :  { %1549 = vmatpush3.bf16.msra.mxu1 %v1703_v35 }
  0x5e   :  { %1550 = vmatprep.subr.bf16.mxu1 %v1706_v38 }
  0x5f   :  { %1529 = vmatpush3.bf16.msra.mxu0 %v1705_v37 }
  0x60   :  { %1570 = vmatprep.subr.bf16.mxu0 %v1725_v42 }
  0x61   :  { %1551 = vmatpush3.bf16.msra.mxu1 %v1707_v39 }
  0x62   :  { %1578 = vmatprep.subr.bf16.mxu1 %v1725_v42  ;;  %1092 = vmatmul.mubr.bf16.vlgmr.msra.gmra.mrb[8].mxu0 %v1708_v40 }
  0x63   :  { %1571 = vmatpush3.bf16.msra.mxu0 %v1714_v45  ;;  %1574 = vmatprep.mubr.msk.bf16.mxu0 %vm1726_vm0, %v1725_v42 }
  0x64   :  { %1133 = vmatmul.mubr.bf16.vlgmr.msra.gmra.mrb[8].mxu1 %v1711_v43  ;;  %1572 = vmatprep.subr.bf16.mxu0 %v1725_v42 }
  0x65   :  { %1594 = vmatprep.mubr.msk.bf16.mxu1 %vm1726_vm0, %v1725_v42  ;;  %1579 = vmatpush3.bf16.msra.mxu1 %v1717_v48 }
  0x66   :  { %1580 = vmatprep.subr.bf16.mxu1 %v1725_v42 }
  0x67   :  { %1573 = vmatpush3.bf16.msra.mxu0 %v1715_v46 }
  0x69   :  { %1581 = vmatpush3.bf16.msra.mxu1 %v1718_v49 }
  0x6a   :  { %1575 = vmatmul.mubr.msk.bf16.vlgmr.msra.gmra.mrb[12].mxu0 %vm891_vm1, %v1716_v47  ;;  %1582 = vmatprep.subr.bf16.mxu1 %v1725_v42 }
  0x6d   :  { %1583 = vmatpush3.bf16.msra.mxu1 %v1719_v50  ;;  %v1417_v50 = vld [vmem:[%s2130_s4] ss:$0 sm:$0xff] }
  0x6e   :  { %1584 = vmatprep.subr.bf16.mxu1 %v1725_v42 }
  0x71   :  { %1585 = vmatpush3.bf16.msra.mxu1 %v1720_v51 }
  0x72   :  { %1586 = vmatprep.subr.bf16.mxu1 %v1725_v42 }
  0x75   :  { %1587 = vmatpush3.bf16.msra.mxu1 %v1721_v52 }
  0x76   :  { %1588 = vmatprep.subr.bf16.mxu1 %v1725_v42 }
  0x79   :  { %1589 = vmatpush3.bf16.msra.mxu1 %v1722_v53 }
  0x7a   :  { %1590 = vmatprep.subr.bf16.mxu1 %v1725_v42 }
  0x7d   :  { %1591 = vmatpush3.bf16.msra.mxu1 %v1723_v54 }
  0x7e   :  { %1592 = vmatprep.subr.bf16.mxu1 %v1725_v42 }
  0x81   :  { %1593 = vmatpush3.bf16.msra.mxu1 %v1724_v55 }
  0xf5   :  { %v1442_v56 = vpop.f32.mrb[0].mxu0 }
  0xf6   :  { %v1443_v58 = vpop.f32.mrb[1].mxu0 }
  0xf7   :  { %v1444_v59 = vadd.f32 %v1443_v58, %v1442_v56  ;;  %v1445_v60 = vpop.f32.mrb[2].mxu0  ;;  %v1464_v61 = vpop.f32.mrb[0].mxu1 }
  0xf8   :  { %v1446_v62 = vpop.f32.mrb[3].mxu0  ;;  %v1465_v63 = vpop.f32.mrb[1].mxu1 }
  0xf9   :  { %v930_v0 = vadd.f32 %v1444_v59, %v1304_v57  ;;  %v1447_v1 = vadd.f32 %v1446_v62, %v1445_v60  ;;  %v1466_v2 = vadd.f32 %v1465_v63, %v1464_v61  ;;  %v1467_v3 = vpop.f32.mrb[2].mxu1 }
  0xfa   :  { %v1468_v4 = vpop.f32.mrb[3].mxu1 }
  0xfb   :  { %v933_v5 = vadd.f32 %v1447_v1, %v1304_v57  ;;  %v971_v6 = vadd.f32 %v1466_v2, %v930_v0  ;;  %v1469_v7 = vadd.f32 %v1468_v4, %v1467_v3 }
  0xfd   :  { %v974_v8 = vadd.f32 %v1469_v7, %v933_v5 }
 0x115   :  { %v1486_v9 = vpop.f32.mrb[4].mxu0 }
 0x116   :  { %v1487_v10 = vpop.f32.mrb[5].mxu0 }
 0x117   :  { %v1488_v11 = vadd.f32 %v1487_v10, %v1486_v9  ;;  %v1489_v12 = vpop.f32.mrb[6].mxu0  ;;  %v1508_v13 = vpop.f32.mrb[4].mxu1 }
 0x118   :  { %v1490_v14 = vpop.f32.mrb[7].mxu0  ;;  %v1509_v17 = vpop.f32.mrb[5].mxu1 }
 0x119   :  { %v1012_v15 = vadd.f32 %v1488_v11, %v971_v6  ;;  %v1491_v16 = vadd.f32 %v1490_v14, %v1489_v12  ;;  %v1510_v18 = vadd.f32 %v1509_v17, %v1508_v13  ;;  %v1511_v19 = vpop.f32.mrb[6].mxu1 }
 0x11a   :  { %v1512_v21 = vpop.f32.mrb[7].mxu1 }
 0x11b   :  { %v1015_v20 = vadd.f32 %v1491_v16, %v974_v8  ;;  %v1053_v22 = vadd.f32 %v1510_v18, %v1012_v15  ;;  %v1513_v23 = vadd.f32 %v1512_v21, %v1511_v19 }
 0x11d   :  { %v1056_v24 = vadd.f32 %v1513_v23, %v1015_v20 }
 0x135   :  { %v1530_v25 = vpop.f32.mrb[8].mxu0 }
 0x136   :  { %v1531_v26 = vpop.f32.mrb[9].mxu0 }
 0x137   :  { %v1552_v27 = vpop.f32.mrb[8].mxu1  ;;  %v1532_v28 = vadd.f32 %v1531_v26, %v1530_v25  ;;  %v1533_v29 = vpop.f32.mrb[10].mxu0 }
 0x138   :  { %v1553_v30 = vpop.f32.mrb[9].mxu1  ;;  %v1534_v32 = vpop.f32.mrb[11].mxu0 }
 0x139   :  { %v1554_v31 = vadd.f32 %v1553_v30, %v1552_v27  ;;  %v1555_v33 = vpop.f32.mrb[10].mxu1  ;;  %v1094_v34 = vadd.f32 %v1532_v28, %v1053_v22  ;;  %v1535_v35 = vadd.f32 %v1534_v32, %v1533_v29 }
 0x13a   :  { %v1556_v36 = vpop.f32.mrb[11].mxu1 }
 0x13b   :  { %v1557_v37 = vadd.f32 %v1556_v36, %v1555_v33  ;;  %v1097_v38 = vadd.f32 %v1535_v35, %v1056_v24  ;;  %v1135_v39 = vadd.f32 %v1554_v31, %v1094_v34 }
 0x13d   :  { %v1175_v40 = vpop.f32.mrb[12].mxu0  ;;  %v1138_v41 = vadd.f32 %v1557_v37, %v1097_v38 }
 0x13e   :  { %v1176_v42 = vadd.f32 %v1175_v40, %v1135_v39  ;;  %v1576_v43 = vpop.f32.mrb[13].mxu0 }
 0x13f   :  { %v1178_v44 = vpop.f32.mrb[14].mxu0 }
 0x140   :  { %v1179_v45 = vadd.f32 %v1178_v44, %v1138_v41  ;;  %v1577_v46 = vpop.f32.mrb[15].mxu0  ;;  %v1182_v47 = vmax.f32 %v1176_v42, 0.0 }
 0x142   :  { %v1183_v48 = vmax.f32 %v1179_v45, 0.0 }
 0x144   :  { %v1184_v49 = vpack.c.bf16 %v1183_v48, %v1182_v47 }
 0x146   :  { %1595 = vmatmul.mubr.bf16.vlgmr.msra.gmra.mrb[12].mxu1 %v1184_v49 }
 0x219   :  { %v1290_v51 = vpop.f32.mrb[12].mxu1 }
 0x21a   :  { %v1291_v52 = vadd.f32 %v1417_v50, %v1290_v51  ;;  %v1596_v53 = vpop.f32.mrb[13].mxu1 }
 0x21b   :  { %v1293_v54 = vpop.f32.mrb[14].mxu1 }
 0x21c   :  { %1298 = vst.msk [vmem:[%s2131_s5] sm:$0xff] %vm1297_vm2, %v1291_v52  ;;  %v1294_v55 = vadd.f32 %v1417_v50, %v1293_v54  ;;  %v1597_v56 = vpop.f32.mrb[15].mxu1 }
 0x21e   :  { %1299 = vst.msk [vmem:[%s2131_s5 + $0x8] sm:$0xff] %vm1297_vm2, %v1294_v55 }

</bundles_post_ra>
